<compile_context>
chip_gen: v7x
topology: tpu7x:2x2x1
jax: 0.10.0
libtpu: 0.0.40
codegen_flags: <defaults>
</compile_context>

<pallas_src>
import functools
import math

import jax
import jax.numpy as jnp
from jax.experimental import pallas as pl
from jax.experimental.pallas import tpu as pltpu


def _round_up(x, m):
    return (x + m - 1) // m * m


def _graph_attention_kernel(n_heads, seg_d, seg_h,
                            x_ref, adj_ref, w_ref, b_ref, a4_ref,
                            gamma_ref, beta_ref, o_ref):
    bt, n, d = x_ref.shape
    dd = d // n_heads
    width = w_ref.shape[1]

    # ---- fused projections on the MXU: bf16 operands, f32 accumulation ----
    # Column layout of w_ref/b_ref (each segment starts on a 128-lane tile):
    #   [0*seg_d : +d]          fc_val(x)
    #   [1*seg_d : +d]          fc(x)    (affinity rows + residual)
    #   [2*seg_d : +d]          fc2(x)   (affinity cols)
    #   [3*seg_d : +H]          0.6 * fc(x)  @ blockdiag(a) + fc_aff_bias
    #   [3*seg_d+seg_h : +H]    0.6 * fc2(x) @ blockdiag(a)
    x2 = x_ref[...].reshape(bt * n, d)
    proj = jnp.dot(x2, w_ref[...], preferred_element_type=jnp.float32)
    proj = (proj + b_ref[...]).reshape(bt, n, width)

    val = proj[:, :, 0:d]
    aff = proj[:, :, seg_d:seg_d + d]
    aff2 = proj[:, :, 2 * seg_d:2 * seg_d + d]
    lin1 = proj[:, :, 3 * seg_d:3 * seg_d + n_heads]                  # (bt,n,H)
    lin2 = proj[:, :, 3 * seg_d + seg_h:3 * seg_d + seg_h + n_heads]  # (bt,n,H)

    aff2_t = jnp.transpose(aff2, (0, 2, 1))       # (bt, d, n)
    lin2_t = jnp.transpose(lin2, (0, 2, 1))       # (bt, H, n)
    val_b = val.astype(jnp.bfloat16)              # cast once for the MXU

    # Adjacency mask bias, computed once and reused by every head.
    mask_bias = jnp.where(adj_ref[...] < 1e-5, -1e9, 0.0).astype(jnp.float32)

    head_outs = []
    for h in range(n_heads):        # static unroll; fine for small H and dd
        lo = h * dd
        # leaky_relu(z, 0.2) = 0.6*z + 0.4*|z|.  The separable 0.6*z part is
        # the rank-1 (n,1)+(1,n) term below (already produced by the fused
        # matmul, fc_aff_bias folded into lin1's bias); only the 0.4*|z| part
        # needs the per-feature accumulation on the VPU.
        logits = mask_bias + lin1[:, :, h:h + 1] + lin2_t[:, h:h + 1, :]
        for kk in range(dd):
            k = lo + kk
            pair = aff[:, :, k:k + 1] + aff2_t[:, k:k + 1, :]   # (bt, n, n)
            logits = logits + a4_ref[k] * jnp.abs(pair)         # a4 = 0.4*a

        # softmax along the lane axis
        m = jnp.max(logits, axis=-1, keepdims=True)
        p = jnp.exp(logits - m)
        s = jnp.sum(p, axis=-1, keepdims=True)
        attn = p * pl.reciprocal(s, approx=True)

        head_outs.append(jnp.einsum(
            'bij,bjd->bid',
            attn.astype(jnp.bfloat16), val_b[:, :, lo:lo + dd],
            preferred_element_type=jnp.float32))

    attn_out = jnp.concatenate(head_outs, axis=-1)    # (bt, n, d)

    # Residual with fc(x) (exactly like the torch code), LayerNorm(eps=1e-5),
    # ReLU.
    pre = aff + attn_out
    mu = jnp.mean(pre, axis=-1, keepdims=True)
    var = jnp.mean((pre - mu) ** 2, axis=-1, keepdims=True)
    y = (pre - mu) * jax.lax.rsqrt(var + 1e-5) * gamma_ref[0] + beta_ref[0]
    y = jnp.maximum(y, 0.0)

    # Lane-dense store: fold (bt, n, d) -> (bt, n*d) by concatenating node
    # rows along the lane axis, so the output block's minor dim is n*d
    # (a multiple of 128 here) instead of d < 128 (masked vst.msk stores).
    y_flat = jnp.concatenate([y[:, i, :] for i in range(n)], axis=-1)
    o_ref[0] = y_flat


def _build_fused_params(params, n_heads):
    """Fuse the three projections (+ the separable affinity term) into one
    128-lane-aligned weight/bias pair, and pre-scale the affinity vector."""
    wv, bv, w1, b1, w2, b2, a, ab, gamma, beta = params
    d = wv.shape[0]
    dd = d // n_heads
    seg_d = _round_up(d, 128)
    seg_h = _round_up(n_heads, 128)
    width = 3 * seg_d + 2 * seg_h

    # Block-diagonal per-head affinity coefficients: A[k, h] = a[h, k - h*dd].
    A = jnp.zeros((d, n_heads), jnp.float32)
    for h in range(n_heads):
        A = A.at[h * dd:(h + 1) * dd, h].set(a[h])

    W = jnp.zeros((d, width), jnp.float32)
    B = jnp.zeros((1, width), jnp.float32)
    o0, o1, o2, o3, o4 = 0, seg_d, 2 * seg_d, 3 * seg_d, 3 * seg_d + seg_h
    W = W.at[:, o0:o0 + d].set(wv)
    W = W.at[:, o1:o1 + d].set(w1)
    W = W.at[:, o2:o2 + d].set(w2)
    W = W.at[:, o3:o3 + n_heads].set(0.6 * (w1 @ A))
    W = W.at[:, o4:o4 + n_heads].set(0.6 * (w2 @ A))
    B = B.at[:, o0:o0 + d].set(bv)
    B = B.at[:, o1:o1 + d].set(b1)
    B = B.at[:, o2:o2 + d].set(b2)
    B = B.at[:, o3:o3 + n_heads].set(0.6 * (b1 @ A) + ab)   # fc_aff_bias folded
    B = B.at[:, o4:o4 + n_heads].set(0.6 * (b2 @ A))

    a4 = (0.4 * a).reshape(-1).astype(jnp.float32)          # (d,) -> SMEM
    return W, B, a4, seg_d, seg_h


def _vmem_estimate(bt, n, d, width):
    # double-buffered x(bf16)/adj(f32)/out(f32) blocks + replicated weights
    io = 2 * (bt * n * d * 2 + bt * n * n * 4 + bt * n * d * 4)
    wts = 2 * (d * width * 2 + width * 4 + 2 * d * 4)
    return io + wts


def _pick_batch_tile(bs, n, d, width):
    # Fill the MXU M dimension (target bt*n >= 256 rows), keep >= 2 grid steps
    # so both v7x TensorCores get work, require bs % bt == 0, and stay inside
    # a conservative VMEM budget (sized against v7x's 64 MiB per-TC).
    bt = min(bs, max(1, pl.cdiv(256, n)))
    while bt > 1 and bs // bt < 2:        # >= 2 grid steps (v7x megacore)
        bt -= 1
    while bs % bt:
        bt -= 1
    budget = 24 * 1024 * 1024
    while bt > 1 and _vmem_estimate(bt, n, d, width) > budget:
        bt = max(1, bt // 2)
        while bs % bt:
            bt -= 1
    return bt


def graph_attention(x, adj, params, n_heads, batch_tile=None):
    bs, n, d = x.shape
    assert d % n_heads == 0
    gamma, beta = params[8], params[9]

    W, B, a4, seg_d, seg_h = _build_fused_params(params, n_heads)
    width = W.shape[1]

    if batch_tile is None:
        batch_tile = _pick_batch_tile(bs, n, d, width)
    bt = batch_tile
    assert bs % bt == 0, "bs must be divisible by batch_tile"

    vmem_limit = int(min(64 << 20, max(32 << 20, 4 * _vmem_estimate(bt, n, d, width))))

    kernel = functools.partial(_graph_attention_kernel, n_heads, seg_d, seg_h)

    def rep(shape):   # grid-invariant (replicated) VMEM operand
        return pl.BlockSpec(shape, lambda b: tuple(0 for _ in shape))

    smem = pl.BlockSpec(memory_space=pltpu.MemorySpace.SMEM)

    grid_spec = pltpu.PrefetchScalarGridSpec(
        num_scalar_prefetch=0,
        grid=(bs // bt,),
        in_specs=[
            pl.BlockSpec((bt, n, d), lambda b: (b, 0, 0)),     # x   (bf16)
            pl.BlockSpec((bt, n, n), lambda b: (b, 0, 0)),     # adj (f32)
            rep((d, width)),                                   # fused weights (bf16)
            rep((1, width)),                                   # fused bias    (f32)
            smem,                                              # 0.4*fc_aff    (d,)
            rep((1, d)), rep((1, d)),                          # LN gamma, beta
        ],
        # Lane-dense output: block (1, bt, n*d); the last two block dims equal
        # the full array dims, so the (8,128) tiling constraint holds for any
        # bt, and the minor store dim is n*d instead of d.
        out_specs=pl.BlockSpec((1, bt, n * d), lambda b: (b, 0, 0)),
    )

    out = pl.pallas_call(
        kernel,
        out_shape=jax.ShapeDtypeStruct((bs // bt, bt, n * d), jnp.float32),
        grid_spec=grid_spec,
        compiler_params=pltpu.CompilerParams(
            dimension_semantics=("parallel",),
            vmem_limit_bytes=vmem_limit),
    )(x.astype(jnp.bfloat16), adj.astype(jnp.float32),
      W.astype(jnp.bfloat16), B, a4, gamma, beta)

    return out.reshape(bs, n, d)


def reference(x, adj, params, n_heads):
    """Pure-JAX f32 mirror of the PyTorch forward (t=0, use_residual=True)."""
    wv, bv, w1, b1, w2, b2, a, ab, gamma, beta = params
    bs, n, d = x.shape
    dd = d // n_heads
    val = x @ wv + bv
    aff = x @ w1 + b1
    aff2 = x @ w2 + b2
    val_h = val.reshape(bs, n, n_heads, dd).transpose(0, 2, 1, 3)
    aff_h = aff.reshape(bs, n, n_heads, dd).transpose(0, 2, 1, 3)
    aff2_h = aff2.reshape(bs, n, n_heads, dd).transpose(0, 2, 1, 3)
    v = aff_h[:, :, :, None, :] + aff2_h[:, :, None, :, :]   # (bs,H,n,n,dd)
    v = jnp.where(v >= 0, v, 0.2 * v)
    logits = jnp.einsum('bhijk,hk->bhij', v, a) + ab[0][None, :, None, None]
    logits = jnp.where((adj < 1e-5)[:, None, :, :], -1e9, logits)
    attn = jax.nn.softmax(logits, axis=-1)
    out = jnp.einsum('bhij,bhjd->bhid', attn, val_h)
    out = out.transpose(0, 2, 1, 3).reshape(bs, n, d)
    pre = aff + out
    mu = pre.mean(-1, keepdims=True)
    var = ((pre - mu) ** 2).mean(-1, keepdims=True)
    normed = (pre - mu) / jnp.sqrt(var + 1e-5)
    return jnp.maximum(normed * gamma[0] + beta[0], 0.0)


def init_params(key, d, n_heads):
    dd = d // n_heads
    ks = jax.random.split(key, 8)
    lb = 1.0 / math.sqrt(d)            # nn.Linear default-ish uniform bound
    ab_bound = 1.0 / math.sqrt(dd)
    wv = jax.random.uniform(ks[0], (d, d), jnp.float32, -lb, lb)
    bv = jax.random.uniform(ks[1], (1, d), jnp.float32, -lb, lb)
    w1 = jax.random.uniform(ks[2], (d, d), jnp.float32, -lb, lb)
    b1 = jax.random.uniform(ks[3], (1, d), jnp.float32, -lb, lb)
    w2 = jax.random.uniform(ks[4], (d, d), jnp.float32, -lb, lb)
    b2 = jax.random.uniform(ks[5], (1, d), jnp.float32, -lb, lb)
    a = jax.random.uniform(ks[6], (n_heads, dd), jnp.float32, -ab_bound, ab_bound)
    ab = jax.random.uniform(ks[7], (1, n_heads), jnp.float32, -ab_bound, ab_bound)
    gamma = jnp.ones((1, d), jnp.float32)    # LayerNorm default init
    beta = jnp.zeros((1, d), jnp.float32)
    return (wv, bv, w1, b1, w2, b2, a, ab, gamma, beta)


if __name__ == "__main__":
    bs, n, d, n_heads = 2, 8, 32, 4     # small, d % n_heads == 0
    key = jax.random.PRNGKey(0)
    kx, kadj, kp = jax.random.split(key, 3)

    x = jax.random.normal(kx, (bs, n, d), jnp.float32)
    adj = (jax.random.uniform(kadj, (bs, n, n)) > 0.5).astype(jnp.float32)
    adj = jnp.maximum(adj, jnp.eye(n, dtype=jnp.float32)[None])   # self loops

    params = init_params(kp, d, n_heads)

    out = graph_attention(x, adj, params, n_heads)
    out = jax.block_until_ready(out)

    ref = reference(x, adj, params, n_heads)
    assert out.shape == (bs, n, d)
    # Tolerance covers bf16 MXU operands (f32 accumulation) and the EUP
    # approximate reciprocal in the softmax denominator; the pure-JAX
    # reference above runs in full f32.
    err = float(jnp.max(jnp.abs(out - ref)))
    assert jnp.allclose(out, ref, atol=5e-2, rtol=5e-2), f"mismatch vs reference (max abs err {err})"

    print("KERNEL_OK")
</pallas_src>

<mosaic_0001>
module attributes {stable_mosaic.version = 11 : i64} {
  func.func @_graph_attention_kernel(%arg0: i32, %arg1: memref<1x8x32xbf16, #tpu.memory_space<vmem>>, %arg2: memref<1x8x8xf32, #tpu.memory_space<vmem>>, %arg3: memref<32x640xbf16, #tpu.memory_space<vmem>>, %arg4: memref<1x640xf32, #tpu.memory_space<vmem>>, %arg5: memref<32xf32, #tpu.memory_space<smem>>, %arg6: memref<1x32xf32, #tpu.memory_space<vmem>>, %arg7: memref<1x32xf32, #tpu.memory_space<vmem>>, %arg8: memref<1x1x256xf32, #tpu.memory_space<vmem>>) attributes {dimension_semantics = [#tpu.dimension_semantics<parallel>], iteration_bounds = array<i64: 2>, scalar_prefetch = 0 : i64, scratch_operands = 0 : i64, tpu.core_type = #tpu.core_type<tc>, window_params = [{transform_indices = @transform_0, window_bounds = array<i64: 1, 8, 32>}, {transform_indices = @transform_1, window_bounds = array<i64: 1, 8, 8>}, {pipeline_mode = #tpu.pipeline_mode<synchronous>, transform_indices = @transform_2, window_bounds = array<i64: 32, 640>}, {pipeline_mode = #tpu.pipeline_mode<synchronous>, transform_indices = @transform_3, window_bounds = array<i64: 1, 640>}, {transform_indices = @transform_4, window_bounds = array<i64: 32>}, {pipeline_mode = #tpu.pipeline_mode<synchronous>, transform_indices = @transform_5, window_bounds = array<i64: 1, 32>}, {pipeline_mode = #tpu.pipeline_mode<synchronous>, transform_indices = @transform_6, window_bounds = array<i64: 1, 32>}, {transform_indices = @transform_7, window_bounds = array<i64: 1, 1, 256>}]} {
    %c0 = arith.constant 0 : index
    %c0_0 = arith.constant 0 : index
    %c0_1 = arith.constant 0 : index
    %0 = vector.load %arg1[%c0, %c0_0, %c0_1] : memref<1x8x32xbf16, #tpu.memory_space<vmem>>, vector<1x8x32xbf16>
    %1 = vector.shape_cast %0 : vector<1x8x32xbf16> to vector<8x32xbf16>
    %c0_2 = arith.constant 0 : index
    %c0_3 = arith.constant 0 : index
    %2 = vector.load %arg3[%c0_2, %c0_3] : memref<32x640xbf16, #tpu.memory_space<vmem>>, vector<32x640xbf16>
    %cst = arith.constant dense<0.000000e+00> : vector<8x640xf32>
    %3 = tpu.matmul %1, %2, %cst {dimension_numbers = #tpu.dot_dimension_numbers<[1], [0], [0], [1], [0, 0, 1, 1], [], []>} : vector<8x32xbf16>, vector<32x640xbf16>, vector<8x640xf32> -> vector<8x640xf32>
    %c0_4 = arith.constant 0 : index
    %c0_5 = arith.constant 0 : index
    %4 = vector.load %arg4[%c0_4, %c0_5] : memref<1x640xf32, #tpu.memory_space<vmem>>, vector<1x640xf32>
    %5 = vector.broadcast %4 : vector<1x640xf32> to vector<8x640xf32>
    %6 = arith.addf %3, %5 : vector<8x640xf32>
    %7 = vector.shape_cast %6 : vector<8x640xf32> to vector<1x8x640xf32>
    %8 = vector.extract_strided_slice %7 {offsets = [0, 0, 0], sizes = [1, 8, 32], strides = [1, 1, 1]} : vector<1x8x640xf32> to vector<1x8x32xf32>
    %9 = vector.extract_strided_slice %7 {offsets = [0, 0, 128], sizes = [1, 8, 32], strides = [1, 1, 1]} : vector<1x8x640xf32> to vector<1x8x32xf32>
    %10 = vector.extract_strided_slice %7 {offsets = [0, 0, 256], sizes = [1, 8, 32], strides = [1, 1, 1]} : vector<1x8x640xf32> to vector<1x8x32xf32>
    %11 = vector.extract_strided_slice %7 {offsets = [0, 0, 384], sizes = [1, 8, 4], strides = [1, 1, 1]} : vector<1x8x640xf32> to vector<1x8x4xf32>
    %12 = vector.extract_strided_slice %7 {offsets = [0, 0, 512], sizes = [1, 8, 4], strides = [1, 1, 1]} : vector<1x8x640xf32> to vector<1x8x4xf32>
    %13 = tpu.transpose %10, [0, 2, 1] : vector<1x8x32xf32> -> vector<1x32x8xf32>
    %14 = tpu.transpose %12, [0, 2, 1] : vector<1x8x4xf32> -> vector<1x4x8xf32>
    %15 = arith.truncf %8 : vector<1x8x32xf32> to vector<1x8x32xbf16>
    %c0_6 = arith.constant 0 : index
    %c0_7 = arith.constant 0 : index
    %c0_8 = arith.constant 0 : index
    %16 = vector.load %arg2[%c0_6, %c0_7, %c0_8] : memref<1x8x8xf32, #tpu.memory_space<vmem>>, vector<1x8x8xf32>
    %cst_9 = arith.constant 9.99999974E-6 : f32
    %17 = vector.broadcast %cst_9 : f32 to vector<1x8x8xf32>
    %18 = arith.cmpf olt, %16, %17 : vector<1x8x8xf32>
    %cst_10 = arith.constant -1.000000e+09 : f32
    %cst_11 = arith.constant 0.000000e+00 : f32
    %19 = vector.broadcast %cst_10 : f32 to vector<1x8x8xf32>
    %20 = vector.broadcast %cst_11 : f32 to vector<1x8x8xf32>
    %21 = arith.select %18, %19, %20 : vector<1x8x8xi1>, vector<1x8x8xf32>
    %22 = vector.extract_strided_slice %11 {offsets = [0, 0, 0], sizes = [1, 8, 1], strides = [1, 1, 1]} : vector<1x8x4xf32> to vector<1x8x1xf32>
    %23 = vector.broadcast %22 : vector<1x8x1xf32> to vector<1x8x8xf32>
    %24 = arith.addf %21, %23 : vector<1x8x8xf32>
    %25 = vector.extract_strided_slice %14 {offsets = [0, 0, 0], sizes = [1, 1, 8], strides = [1, 1, 1]} : vector<1x4x8xf32> to vector<1x1x8xf32>
    %26 = vector.broadcast %25 : vector<1x1x8xf32> to vector<1x8x8xf32>
    %27 = arith.addf %24, %26 : vector<1x8x8xf32>
    %28 = vector.extract_strided_slice %9 {offsets = [0, 0, 0], sizes = [1, 8, 1], strides = [1, 1, 1]} : vector<1x8x32xf32> to vector<1x8x1xf32>
    %29 = vector.extract_strided_slice %13 {offsets = [0, 0, 0], sizes = [1, 1, 8], strides = [1, 1, 1]} : vector<1x32x8xf32> to vector<1x1x8xf32>
    %30 = vector.broadcast %28 : vector<1x8x1xf32> to vector<1x8x8xf32>
    %31 = vector.broadcast %29 : vector<1x1x8xf32> to vector<1x8x8xf32>
    %32 = arith.addf %30, %31 : vector<1x8x8xf32>
    %c0_12 = arith.constant 0 : index
    %33 = memref.load %arg5[%c0_12] : memref<32xf32, #tpu.memory_space<smem>>
    %34 = math.absf %32 : vector<1x8x8xf32>
    %35 = vector.broadcast %33 : f32 to vector<1x8x8xf32>
    %36 = arith.mulf %35, %34 : vector<1x8x8xf32>
    %37 = arith.addf %27, %36 : vector<1x8x8xf32>
    %38 = vector.extract_strided_slice %9 {offsets = [0, 0, 1], sizes = [1, 8, 1], strides = [1, 1, 1]} : vector<1x8x32xf32> to vector<1x8x1xf32>
    %39 = vector.extract_strided_slice %13 {offsets = [0, 1, 0], sizes = [1, 1, 8], strides = [1, 1, 1]} : vector<1x32x8xf32> to vector<1x1x8xf32>
    %40 = vector.broadcast %38 : vector<1x8x1xf32> to vector<1x8x8xf32>
    %41 = vector.broadcast %39 : vector<1x1x8xf32> to vector<1x8x8xf32>
    %42 = arith.addf %40, %41 : vector<1x8x8xf32>
    %c1 = arith.constant 1 : index
    %43 = memref.load %arg5[%c1] : memref<32xf32, #tpu.memory_space<smem>>
    %44 = math.absf %42 : vector<1x8x8xf32>
    %45 = vector.broadcast %43 : f32 to vector<1x8x8xf32>
    %46 = arith.mulf %45, %44 : vector<1x8x8xf32>
    %47 = arith.addf %37, %46 : vector<1x8x8xf32>
    %48 = vector.extract_strided_slice %9 {offsets = [0, 0, 2], sizes = [1, 8, 1], strides = [1, 1, 1]} : vector<1x8x32xf32> to vector<1x8x1xf32>
    %49 = vector.extract_strided_slice %13 {offsets = [0, 2, 0], sizes = [1, 1, 8], strides = [1, 1, 1]} : vector<1x32x8xf32> to vector<1x1x8xf32>
    %50 = vector.broadcast %48 : vector<1x8x1xf32> to vector<1x8x8xf32>
    %51 = vector.broadcast %49 : vector<1x1x8xf32> to vector<1x8x8xf32>
    %52 = arith.addf %50, %51 : vector<1x8x8xf32>
    %c2 = arith.constant 2 : index
    %53 = memref.load %arg5[%c2] : memref<32xf32, #tpu.memory_space<smem>>
    %54 = math.absf %52 : vector<1x8x8xf32>
    %55 = vector.broadcast %53 : f32 to vector<1x8x8xf32>
    %56 = arith.mulf %55, %54 : vector<1x8x8xf32>
    %57 = arith.addf %47, %56 : vector<1x8x8xf32>
    %58 = vector.extract_strided_slice %9 {offsets = [0, 0, 3], sizes = [1, 8, 1], strides = [1, 1, 1]} : vector<1x8x32xf32> to vector<1x8x1xf32>
    %59 = vector.extract_strided_slice %13 {offsets = [0, 3, 0], sizes = [1, 1, 8], strides = [1, 1, 1]} : vector<1x32x8xf32> to vector<1x1x8xf32>
    %60 = vector.broadcast %58 : vector<1x8x1xf32> to vector<1x8x8xf32>
    %61 = vector.broadcast %59 : vector<1x1x8xf32> to vector<1x8x8xf32>
    %62 = arith.addf %60, %61 : vector<1x8x8xf32>
    %c3 = arith.constant 3 : index
    %63 = memref.load %arg5[%c3] : memref<32xf32, #tpu.memory_space<smem>>
    %64 = math.absf %62 : vector<1x8x8xf32>
    %65 = vector.broadcast %63 : f32 to vector<1x8x8xf32>
    %66 = arith.mulf %65, %64 : vector<1x8x8xf32>
    %67 = arith.addf %57, %66 : vector<1x8x8xf32>
    %68 = vector.extract_strided_slice %9 {offsets = [0, 0, 4], sizes = [1, 8, 1], strides = [1, 1, 1]} : vector<1x8x32xf32> to vector<1x8x1xf32>
    %69 = vector.extract_strided_slice %13 {offsets = [0, 4, 0], sizes = [1, 1, 8], strides = [1, 1, 1]} : vector<1x32x8xf32> to vector<1x1x8xf32>
    %70 = vector.broadcast %68 : vector<1x8x1xf32> to vector<1x8x8xf32>
    %71 = vector.broadcast %69 : vector<1x1x8xf32> to vector<1x8x8xf32>
    %72 = arith.addf %70, %71 : vector<1x8x8xf32>
    %c4 = arith.constant 4 : index
    %73 = memref.load %arg5[%c4] : memref<32xf32, #tpu.memory_space<smem>>
    %74 = math.absf %72 : vector<1x8x8xf32>
    %75 = vector.broadcast %73 : f32 to vector<1x8x8xf32>
    %76 = arith.mulf %75, %74 : vector<1x8x8xf32>
    %77 = arith.addf %67, %76 : vector<1x8x8xf32>
    %78 = vector.extract_strided_slice %9 {offsets = [0, 0, 5], sizes = [1, 8, 1], strides = [1, 1, 1]} : vector<1x8x32xf32> to vector<1x8x1xf32>
    %79 = vector.extract_strided_slice %13 {offsets = [0, 5, 0], sizes = [1, 1, 8], strides = [1, 1, 1]} : vector<1x32x8xf32> to vector<1x1x8xf32>
    %80 = vector.broadcast %78 : vector<1x8x1xf32> to vector<1x8x8xf32>
    %81 = vector.broadcast %79 : vector<1x1x8xf32> to vector<1x8x8xf32>
    %82 = arith.addf %80, %81 : vector<1x8x8xf32>
    %c5 = arith.constant 5 : index
    %83 = memref.load %arg5[%c5] : memref<32xf32, #tpu.memory_space<smem>>
    %84 = math.absf %82 : vector<1x8x8xf32>
    %85 = vector.broadcast %83 : f32 to vector<1x8x8xf32>
    %86 = arith.mulf %85, %84 : vector<1x8x8xf32>
    %87 = arith.addf %77, %86 : vector<1x8x8xf32>
    %88 = vector.extract_strided_slice %9 {offsets = [0, 0, 6], sizes = [1, 8, 1], strides = [1, 1, 1]} : vector<1x8x32xf32> to vector<1x8x1xf32>
    %89 = vector.extract_strided_slice %13 {offsets = [0, 6, 0], sizes = [1, 1, 8], strides = [1, 1, 1]} : vector<1x32x8xf32> to vector<1x1x8xf32>
    %90 = vector.broadcast %88 : vector<1x8x1xf32> to vector<1x8x8xf32>
    %91 = vector.broadcast %89 : vector<1x1x8xf32> to vector<1x8x8xf32>
    %92 = arith.addf %90, %91 : vector<1x8x8xf32>
    %c6 = arith.constant 6 : index
    %93 = memref.load %arg5[%c6] : memref<32xf32, #tpu.memory_space<smem>>
    %94 = math.absf %92 : vector<1x8x8xf32>
    %95 = vector.broadcast %93 : f32 to vector<1x8x8xf32>
    %96 = arith.mulf %95, %94 : vector<1x8x8xf32>
    %97 = arith.addf %87, %96 : vector<1x8x8xf32>
    %98 = vector.extract_strided_slice %9 {offsets = [0, 0, 7], sizes = [1, 8, 1], strides = [1, 1, 1]} : vector<1x8x32xf32> to vector<1x8x1xf32>
    %99 = vector.extract_strided_slice %13 {offsets = [0, 7, 0], sizes = [1, 1, 8], strides = [1, 1, 1]} : vector<1x32x8xf32> to vector<1x1x8xf32>
    %100 = vector.broadcast %98 : vector<1x8x1xf32> to vector<1x8x8xf32>
    %101 = vector.broadcast %99 : vector<1x1x8xf32> to vector<1x8x8xf32>
    %102 = arith.addf %100, %101 : vector<1x8x8xf32>
    %c7 = arith.constant 7 : index
    %103 = memref.load %arg5[%c7] : memref<32xf32, #tpu.memory_space<smem>>
    %104 = math.absf %102 : vector<1x8x8xf32>
    %105 = vector.broadcast %103 : f32 to vector<1x8x8xf32>
    %106 = arith.mulf %105, %104 : vector<1x8x8xf32>
    %107 = arith.addf %97, %106 : vector<1x8x8xf32>
    %cst_13 = arith.constant dense<0xFF800000> : vector<1x8xf32>
    %108 = vector.multi_reduction <maximumf>, %107, %cst_13 [2] : vector<1x8x8xf32> to vector<1x8xf32>
    %109 = vector.shape_cast %108 : vector<1x8xf32> to vector<1x8x1xf32>
    %110 = vector.broadcast %109 : vector<1x8x1xf32> to vector<1x8x8xf32>
    %111 = arith.subf %107, %110 : vector<1x8x8xf32>
    %112 = math.exp %111 : vector<1x8x8xf32>
    %cst_14 = arith.constant dense<0.000000e+00> : vector<1x8xf32>
    %113 = vector.multi_reduction <add>, %112, %cst_14 [2] : vector<1x8x8xf32> to vector<1x8xf32>
    %114 = vector.shape_cast %113 : vector<1x8xf32> to vector<1x8x1xf32>
    %115 = tpu.reciprocal %114 {approx = true} : vector<1x8x1xf32> -> vector<1x8x1xf32>
    %116 = vector.broadcast %115 : vector<1x8x1xf32> to vector<1x8x8xf32>
    %117 = arith.mulf %112, %116 : vector<1x8x8xf32>
    %118 = arith.truncf %117 : vector<1x8x8xf32> to vector<1x8x8xbf16>
    %119 = vector.extract_strided_slice %15 {offsets = [0, 0, 0], sizes = [1, 8, 8], strides = [1, 1, 1]} : vector<1x8x32xbf16> to vector<1x8x8xbf16>
    "tpu.trace_start"() <{level = 10 : i32, message = "bij,bjd->bid"}> : () -> ()
    %cst_15 = arith.constant dense<0.000000e+00> : vector<1x8x8xf32>
    %120 = tpu.matmul %118, %119, %cst_15 {dimension_numbers = #tpu.dot_dimension_numbers<[2], [1], [1], [2], [0, 0, 0, 1, 1, 2], [0], [0]>} : vector<1x8x8xbf16>, vector<1x8x8xbf16>, vector<1x8x8xf32> -> vector<1x8x8xf32>
    "tpu.trace_stop"() : () -> ()
    %121 = vector.extract_strided_slice %11 {offsets = [0, 0, 1], sizes = [1, 8, 1], strides = [1, 1, 1]} : vector<1x8x4xf32> to vector<1x8x1xf32>
    %122 = vector.broadcast %121 : vector<1x8x1xf32> to vector<1x8x8xf32>
    %123 = arith.addf %21, %122 : vector<1x8x8xf32>
    %124 = vector.extract_strided_slice %14 {offsets = [0, 1, 0], sizes = [1, 1, 8], strides = [1, 1, 1]} : vector<1x4x8xf32> to vector<1x1x8xf32>
    %125 = vector.broadcast %124 : vector<1x1x8xf32> to vector<1x8x8xf32>
    %126 = arith.addf %123, %125 : vector<1x8x8xf32>
    %127 = vector.extract_strided_slice %9 {offsets = [0, 0, 8], sizes = [1, 8, 1], strides = [1, 1, 1]} : vector<1x8x32xf32> to vector<1x8x1xf32>
    %128 = vector.extract_strided_slice %13 {offsets = [0, 8, 0], sizes = [1, 1, 8], strides = [1, 1, 1]} : vector<1x32x8xf32> to vector<1x1x8xf32>
    %129 = vector.broadcast %127 : vector<1x8x1xf32> to vector<1x8x8xf32>
    %130 = vector.broadcast %128 : vector<1x1x8xf32> to vector<1x8x8xf32>
    %131 = arith.addf %129, %130 : vector<1x8x8xf32>
    %c8 = arith.constant 8 : index
    %132 = memref.load %arg5[%c8] : memref<32xf32, #tpu.memory_space<smem>>
    %133 = math.absf %131 : vector<1x8x8xf32>
    %134 = vector.broadcast %132 : f32 to vector<1x8x8xf32>
    %135 = arith.mulf %134, %133 : vector<1x8x8xf32>
    %136 = arith.addf %126, %135 : vector<1x8x8xf32>
    %137 = vector.extract_strided_slice %9 {offsets = [0, 0, 9], sizes = [1, 8, 1], strides = [1, 1, 1]} : vector<1x8x32xf32> to vector<1x8x1xf32>
    %138 = vector.extract_strided_slice %13 {offsets = [0, 9, 0], sizes = [1, 1, 8], strides = [1, 1, 1]} : vector<1x32x8xf32> to vector<1x1x8xf32>
    %139 = vector.broadcast %137 : vector<1x8x1xf32> to vector<1x8x8xf32>
    %140 = vector.broadcast %138 : vector<1x1x8xf32> to vector<1x8x8xf32>
    %141 = arith.addf %139, %140 : vector<1x8x8xf32>
    %c9 = arith.constant 9 : index
    %142 = memref.load %arg5[%c9] : memref<32xf32, #tpu.memory_space<smem>>
    %143 = math.absf %141 : vector<1x8x8xf32>
    %144 = vector.broadcast %142 : f32 to vector<1x8x8xf32>
    %145 = arith.mulf %144, %143 : vector<1x8x8xf32>
    %146 = arith.addf %136, %145 : vector<1x8x8xf32>
    %147 = vector.extract_strided_slice %9 {offsets = [0, 0, 10], sizes = [1, 8, 1], strides = [1, 1, 1]} : vector<1x8x32xf32> to vector<1x8x1xf32>
    %148 = vector.extract_strided_slice %13 {offsets = [0, 10, 0], sizes = [1, 1, 8], strides = [1, 1, 1]} : vector<1x32x8xf32> to vector<1x1x8xf32>
    %149 = vector.broadcast %147 : vector<1x8x1xf32> to vector<1x8x8xf32>
    %150 = vector.broadcast %148 : vector<1x1x8xf32> to vector<1x8x8xf32>
    %151 = arith.addf %149, %150 : vector<1x8x8xf32>
    %c10 = arith.constant 10 : index
    %152 = memref.load %arg5[%c10] : memref<32xf32, #tpu.memory_space<smem>>
    %153 = math.absf %151 : vector<1x8x8xf32>
    %154 = vector.broadcast %152 : f32 to vector<1x8x8xf32>
    %155 = arith.mulf %154, %153 : vector<1x8x8xf32>
    %156 = arith.addf %146, %155 : vector<1x8x8xf32>
    %157 = vector.extract_strided_slice %9 {offsets = [0, 0, 11], sizes = [1, 8, 1], strides = [1, 1, 1]} : vector<1x8x32xf32> to vector<1x8x1xf32>
    %158 = vector.extract_strided_slice %13 {offsets = [0, 11, 0], sizes = [1, 1, 8], strides = [1, 1, 1]} : vector<1x32x8xf32> to vector<1x1x8xf32>
    %159 = vector.broadcast %157 : vector<1x8x1xf32> to vector<1x8x8xf32>
    %160 = vector.broadcast %158 : vector<1x1x8xf32> to vector<1x8x8xf32>
    %161 = arith.addf %159, %160 : vector<1x8x8xf32>
    %c11 = arith.constant 11 : index
    %162 = memref.load %arg5[%c11] : memref<32xf32, #tpu.memory_space<smem>>
    %163 = math.absf %161 : vector<1x8x8xf32>
    %164 = vector.broadcast %162 : f32 to vector<1x8x8xf32>
    %165 = arith.mulf %164, %163 : vector<1x8x8xf32>
    %166 = arith.addf %156, %165 : vector<1x8x8xf32>
    %167 = vector.extract_strided_slice %9 {offsets = [0, 0, 12], sizes = [1, 8, 1], strides = [1, 1, 1]} : vector<1x8x32xf32> to vector<1x8x1xf32>
    %168 = vector.extract_strided_slice %13 {offsets = [0, 12, 0], sizes = [1, 1, 8], strides = [1, 1, 1]} : vector<1x32x8xf32> to vector<1x1x8xf32>
    %169 = vector.broadcast %167 : vector<1x8x1xf32> to vector<1x8x8xf32>
    %170 = vector.broadcast %168 : vector<1x1x8xf32> to vector<1x8x8xf32>
    %171 = arith.addf %169, %170 : vector<1x8x8xf32>
    %c12 = arith.constant 12 : index
    %172 = memref.load %arg5[%c12] : memref<32xf32, #tpu.memory_space<smem>>
    %173 = math.absf %171 : vector<1x8x8xf32>
    %174 = vector.broadcast %172 : f32 to vector<1x8x8xf32>
    %175 = arith.mulf %174, %173 : vector<1x8x8xf32>
    %176 = arith.addf %166, %175 : vector<1x8x8xf32>
    %177 = vector.extract_strided_slice %9 {offsets = [0, 0, 13], sizes = [1, 8, 1], strides = [1, 1, 1]} : vector<1x8x32xf32> to vector<1x8x1xf32>
    %178 = vector.extract_strided_slice %13 {offsets = [0, 13, 0], sizes = [1, 1, 8], strides = [1, 1, 1]} : vector<1x32x8xf32> to vector<1x1x8xf32>
    %179 = vector.broadcast %177 : vector<1x8x1xf32> to vector<1x8x8xf32>
    %180 = vector.broadcast %178 : vector<1x1x8xf32> to vector<1x8x8xf32>
    %181 = arith.addf %179, %180 : vector<1x8x8xf32>
    %c13 = arith.constant 13 : index
    %182 = memref.load %arg5[%c13] : memref<32xf32, #tpu.memory_space<smem>>
    %183 = math.absf %181 : vector<1x8x8xf32>
    %184 = vector.broadcast %182 : f32 to vector<1x8x8xf32>
    %185 = arith.mulf %184, %183 : vector<1x8x8xf32>
    %186 = arith.addf %176, %185 : vector<1x8x8xf32>
    %187 = vector.extract_strided_slice %9 {offsets = [0, 0, 14], sizes = [1, 8, 1], strides = [1, 1, 1]} : vector<1x8x32xf32> to vector<1x8x1xf32>
    %188 = vector.extract_strided_slice %13 {offsets = [0, 14, 0], sizes = [1, 1, 8], strides = [1, 1, 1]} : vector<1x32x8xf32> to vector<1x1x8xf32>
    %189 = vector.broadcast %187 : vector<1x8x1xf32> to vector<1x8x8xf32>
    %190 = vector.broadcast %188 : vector<1x1x8xf32> to vector<1x8x8xf32>
    %191 = arith.addf %189, %190 : vector<1x8x8xf32>
    %c14 = arith.constant 14 : index
    %192 = memref.load %arg5[%c14] : memref<32xf32, #tpu.memory_space<smem>>
    %193 = math.absf %191 : vector<1x8x8xf32>
    %194 = vector.broadcast %192 : f32 to vector<1x8x8xf32>
    %195 = arith.mulf %194, %193 : vector<1x8x8xf32>
    %196 = arith.addf %186, %195 : vector<1x8x8xf32>
    %197 = vector.extract_strided_slice %9 {offsets = [0, 0, 15], sizes = [1, 8, 1], strides = [1, 1, 1]} : vector<1x8x32xf32> to vector<1x8x1xf32>
    %198 = vector.extract_strided_slice %13 {offsets = [0, 15, 0], sizes = [1, 1, 8], strides = [1, 1, 1]} : vector<1x32x8xf32> to vector<1x1x8xf32>
    %199 = vector.broadcast %197 : vector<1x8x1xf32> to vector<1x8x8xf32>
    %200 = vector.broadcast %198 : vector<1x1x8xf32> to vector<1x8x8xf32>
    %201 = arith.addf %199, %200 : vector<1x8x8xf32>
    %c15 = arith.constant 15 : index
    %202 = memref.load %arg5[%c15] : memref<32xf32, #tpu.memory_space<smem>>
    %203 = math.absf %201 : vector<1x8x8xf32>
    %204 = vector.broadcast %202 : f32 to vector<1x8x8xf32>
    %205 = arith.mulf %204, %203 : vector<1x8x8xf32>
    %206 = arith.addf %196, %205 : vector<1x8x8xf32>
    %cst_16 = arith.constant dense<0xFF800000> : vector<1x8xf32>
    %207 = vector.multi_reduction <maximumf>, %206, %cst_16 [2] : vector<1x8x8xf32> to vector<1x8xf32>
    %208 = vector.shape_cast %207 : vector<1x8xf32> to vector<1x8x1xf32>
    %209 = vector.broadcast %208 : vector<1x8x1xf32> to vector<1x8x8xf32>
    %210 = arith.subf %206, %209 : vector<1x8x8xf32>
    %211 = math.exp %210 : vector<1x8x8xf32>
    %cst_17 = arith.constant dense<0.000000e+00> : vector<1x8xf32>
    %212 = vector.multi_reduction <add>, %211, %cst_17 [2] : vector<1x8x8xf32> to vector<1x8xf32>
    %213 = vector.shape_cast %212 : vector<1x8xf32> to vector<1x8x1xf32>
    %214 = tpu.reciprocal %213 {approx = true} : vector<1x8x1xf32> -> vector<1x8x1xf32>
    %215 = vector.broadcast %214 : vector<1x8x1xf32> to vector<1x8x8xf32>
    %216 = arith.mulf %211, %215 : vector<1x8x8xf32>
    %217 = arith.truncf %216 : vector<1x8x8xf32> to vector<1x8x8xbf16>
    %218 = vector.extract_strided_slice %15 {offsets = [0, 0, 8], sizes = [1, 8, 8], strides = [1, 1, 1]} : vector<1x8x32xbf16> to vector<1x8x8xbf16>
    "tpu.trace_start"() <{level = 10 : i32, message = "bij,bjd->bid"}> : () -> ()
    %cst_18 = arith.constant dense<0.000000e+00> : vector<1x8x8xf32>
    %219 = tpu.matmul %217, %218, %cst_18 {dimension_numbers = #tpu.dot_dimension_numbers<[2], [1], [1], [2], [0, 0, 0, 1, 1, 2], [0], [0]>} : vector<1x8x8xbf16>, vector<1x8x8xbf16>, vector<1x8x8xf32> -> vector<1x8x8xf32>
    "tpu.trace_stop"() : () -> ()
    %220 = vector.extract_strided_slice %11 {offsets = [0, 0, 2], sizes = [1, 8, 1], strides = [1, 1, 1]} : vector<1x8x4xf32> to vector<1x8x1xf32>
    %221 = vector.broadcast %220 : vector<1x8x1xf32> to vector<1x8x8xf32>
    %222 = arith.addf %21, %221 : vector<1x8x8xf32>
    %223 = vector.extract_strided_slice %14 {offsets = [0, 2, 0], sizes = [1, 1, 8], strides = [1, 1, 1]} : vector<1x4x8xf32> to vector<1x1x8xf32>
    %224 = vector.broadcast %223 : vector<1x1x8xf32> to vector<1x8x8xf32>
    %225 = arith.addf %222, %224 : vector<1x8x8xf32>
    %226 = vector.extract_strided_slice %9 {offsets = [0, 0, 16], sizes = [1, 8, 1], strides = [1, 1, 1]} : vector<1x8x32xf32> to vector<1x8x1xf32>
    %227 = vector.extract_strided_slice %13 {offsets = [0, 16, 0], sizes = [1, 1, 8], strides = [1, 1, 1]} : vector<1x32x8xf32> to vector<1x1x8xf32>
    %228 = vector.broadcast %226 : vector<1x8x1xf32> to vector<1x8x8xf32>
    %229 = vector.broadcast %227 : vector<1x1x8xf32> to vector<1x8x8xf32>
    %230 = arith.addf %228, %229 : vector<1x8x8xf32>
    %c16 = arith.constant 16 : index
    %231 = memref.load %arg5[%c16] : memref<32xf32, #tpu.memory_space<smem>>
    %232 = math.absf %230 : vector<1x8x8xf32>
    %233 = vector.broadcast %231 : f32 to vector<1x8x8xf32>
    %234 = arith.mulf %233, %232 : vector<1x8x8xf32>
    %235 = arith.addf %225, %234 : vector<1x8x8xf32>
    %236 = vector.extract_strided_slice %9 {offsets = [0, 0, 17], sizes = [1, 8, 1], strides = [1, 1, 1]} : vector<1x8x32xf32> to vector<1x8x1xf32>
    %237 = vector.extract_strided_slice %13 {offsets = [0, 17, 0], sizes = [1, 1, 8], strides = [1, 1, 1]} : vector<1x32x8xf32> to vector<1x1x8xf32>
    %238 = vector.broadcast %236 : vector<1x8x1xf32> to vector<1x8x8xf32>
    %239 = vector.broadcast %237 : vector<1x1x8xf32> to vector<1x8x8xf32>
    %240 = arith.addf %238, %239 : vector<1x8x8xf32>
    %c17 = arith.constant 17 : index
    %241 = memref.load %arg5[%c17] : memref<32xf32, #tpu.memory_space<smem>>
    %242 = math.absf %240 : vector<1x8x8xf32>
    %243 = vector.broadcast %241 : f32 to vector<1x8x8xf32>
    %244 = arith.mulf %243, %242 : vector<1x8x8xf32>
    %245 = arith.addf %235, %244 : vector<1x8x8xf32>
    %246 = vector.extract_strided_slice %9 {offsets = [0, 0, 18], sizes = [1, 8, 1], strides = [1, 1, 1]} : vector<1x8x32xf32> to vector<1x8x1xf32>
    %247 = vector.extract_strided_slice %13 {offsets = [0, 18, 0], sizes = [1, 1, 8], strides = [1, 1, 1]} : vector<1x32x8xf32> to vector<1x1x8xf32>
    %248 = vector.broadcast %246 : vector<1x8x1xf32> to vector<1x8x8xf32>
    %249 = vector.broadcast %247 : vector<1x1x8xf32> to vector<1x8x8xf32>
    %250 = arith.addf %248, %249 : vector<1x8x8xf32>
    %c18 = arith.constant 18 : index
    %251 = memref.load %arg5[%c18] : memref<32xf32, #tpu.memory_space<smem>>
    %252 = math.absf %250 : vector<1x8x8xf32>
    %253 = vector.broadcast %251 : f32 to vector<1x8x8xf32>
    %254 = arith.mulf %253, %252 : vector<1x8x8xf32>
    %255 = arith.addf %245, %254 : vector<1x8x8xf32>
    %256 = vector.extract_strided_slice %9 {offsets = [0, 0, 19], sizes = [1, 8, 1], strides = [1, 1, 1]} : vector<1x8x32xf32> to vector<1x8x1xf32>
    %257 = vector.extract_strided_slice %13 {offsets = [0, 19, 0], sizes = [1, 1, 8], strides = [1, 1, 1]} : vector<1x32x8xf32> to vector<1x1x8xf32>
    %258 = vector.broadcast %256 : vector<1x8x1xf32> to vector<1x8x8xf32>
    %259 = vector.broadcast %257 : vector<1x1x8xf32> to vector<1x8x8xf32>
    %260 = arith.addf %258, %259 : vector<1x8x8xf32>
    %c19 = arith.constant 19 : index
    %261 = memref.load %arg5[%c19] : memref<32xf32, #tpu.memory_space<smem>>
    %262 = math.absf %260 : vector<1x8x8xf32>
    %263 = vector.broadcast %261 : f32 to vector<1x8x8xf32>
    %264 = arith.mulf %263, %262 : vector<1x8x8xf32>
    %265 = arith.addf %255, %264 : vector<1x8x8xf32>
    %266 = vector.extract_strided_slice %9 {offsets = [0, 0, 20], sizes = [1, 8, 1], strides = [1, 1, 1]} : vector<1x8x32xf32> to vector<1x8x1xf32>
    %267 = vector.extract_strided_slice %13 {offsets = [0, 20, 0], sizes = [1, 1, 8], strides = [1, 1, 1]} : vector<1x32x8xf32> to vector<1x1x8xf32>
    %268 = vector.broadcast %266 : vector<1x8x1xf32> to vector<1x8x8xf32>
    %269 = vector.broadcast %267 : vector<1x1x8xf32> to vector<1x8x8xf32>
    %270 = arith.addf %268, %269 : vector<1x8x8xf32>
    %c20 = arith.constant 20 : index
    %271 = memref.load %arg5[%c20] : memref<32xf32, #tpu.memory_space<smem>>
    %272 = math.absf %270 : vector<1x8x8xf32>
    %273 = vector.broadcast %271 : f32 to vector<1x8x8xf32>
    %274 = arith.mulf %273, %272 : vector<1x8x8xf32>
    %275 = arith.addf %265, %274 : vector<1x8x8xf32>
    %276 = vector.extract_strided_slice %9 {offsets = [0, 0, 21], sizes = [1, 8, 1], strides = [1, 1, 1]} : vector<1x8x32xf32> to vector<1x8x1xf32>
    %277 = vector.extract_strided_slice %13 {offsets = [0, 21, 0], sizes = [1, 1, 8], strides = [1, 1, 1]} : vector<1x32x8xf32> to vector<1x1x8xf32>
    %278 = vector.broadcast %276 : vector<1x8x1xf32> to vector<1x8x8xf32>
    %279 = vector.broadcast %277 : vector<1x1x8xf32> to vector<1x8x8xf32>
    %280 = arith.addf %278, %279 : vector<1x8x8xf32>
    %c21 = arith.constant 21 : index
    %281 = memref.load %arg5[%c21] : memref<32xf32, #tpu.memory_space<smem>>
    %282 = math.absf %280 : vector<1x8x8xf32>
    %283 = vector.broadcast %281 : f32 to vector<1x8x8xf32>
    %284 = arith.mulf %283, %282 : vector<1x8x8xf32>
    %285 = arith.addf %275, %284 : vector<1x8x8xf32>
    %286 = vector.extract_strided_slice %9 {offsets = [0, 0, 22], sizes = [1, 8, 1], strides = [1, 1, 1]} : vector<1x8x32xf32> to vector<1x8x1xf32>
    %287 = vector.extract_strided_slice %13 {offsets = [0, 22, 0], sizes = [1, 1, 8], strides = [1, 1, 1]} : vector<1x32x8xf32> to vector<1x1x8xf32>
    %288 = vector.broadcast %286 : vector<1x8x1xf32> to vector<1x8x8xf32>
    %289 = vector.broadcast %287 : vector<1x1x8xf32> to vector<1x8x8xf32>
    %290 = arith.addf %288, %289 : vector<1x8x8xf32>
    %c22 = arith.constant 22 : index
    %291 = memref.load %arg5[%c22] : memref<32xf32, #tpu.memory_space<smem>>
    %292 = math.absf %290 : vector<1x8x8xf32>
    %293 = vector.broadcast %291 : f32 to vector<1x8x8xf32>
    %294 = arith.mulf %293, %292 : vector<1x8x8xf32>
    %295 = arith.addf %285, %294 : vector<1x8x8xf32>
    %296 = vector.extract_strided_slice %9 {offsets = [0, 0, 23], sizes = [1, 8, 1], strides = [1, 1, 1]} : vector<1x8x32xf32> to vector<1x8x1xf32>
    %297 = vector.extract_strided_slice %13 {offsets = [0, 23, 0], sizes = [1, 1, 8], strides = [1, 1, 1]} : vector<1x32x8xf32> to vector<1x1x8xf32>
    %298 = vector.broadcast %296 : vector<1x8x1xf32> to vector<1x8x8xf32>
    %299 = vector.broadcast %297 : vector<1x1x8xf32> to vector<1x8x8xf32>
    %300 = arith.addf %298, %299 : vector<1x8x8xf32>
    %c23 = arith.constant 23 : index
    %301 = memref.load %arg5[%c23] : memref<32xf32, #tpu.memory_space<smem>>
    %302 = math.absf %300 : vector<1x8x8xf32>
    %303 = vector.broadcast %301 : f32 to vector<1x8x8xf32>
    %304 = arith.mulf %303, %302 : vector<1x8x8xf32>
    %305 = arith.addf %295, %304 : vector<1x8x8xf32>
    %cst_19 = arith.constant dense<0xFF800000> : vector<1x8xf32>
    %306 = vector.multi_reduction <maximumf>, %305, %cst_19 [2] : vector<1x8x8xf32> to vector<1x8xf32>
    %307 = vector.shape_cast %306 : vector<1x8xf32> to vector<1x8x1xf32>
    %308 = vector.broadcast %307 : vector<1x8x1xf32> to vector<1x8x8xf32>
    %309 = arith.subf %305, %308 : vector<1x8x8xf32>
    %310 = math.exp %309 : vector<1x8x8xf32>
    %cst_20 = arith.constant dense<0.000000e+00> : vector<1x8xf32>
    %311 = vector.multi_reduction <add>, %310, %cst_20 [2] : vector<1x8x8xf32> to vector<1x8xf32>
    %312 = vector.shape_cast %311 : vector<1x8xf32> to vector<1x8x1xf32>
    %313 = tpu.reciprocal %312 {approx = true} : vector<1x8x1xf32> -> vector<1x8x1xf32>
    %314 = vector.broadcast %313 : vector<1x8x1xf32> to vector<1x8x8xf32>
    %315 = arith.mulf %310, %314 : vector<1x8x8xf32>
    %316 = arith.truncf %315 : vector<1x8x8xf32> to vector<1x8x8xbf16>
    %317 = vector.extract_strided_slice %15 {offsets = [0, 0, 16], sizes = [1, 8, 8], strides = [1, 1, 1]} : vector<1x8x32xbf16> to vector<1x8x8xbf16>
    "tpu.trace_start"() <{level = 10 : i32, message = "bij,bjd->bid"}> : () -> ()
    %cst_21 = arith.constant dense<0.000000e+00> : vector<1x8x8xf32>
    %318 = tpu.matmul %316, %317, %cst_21 {dimension_numbers = #tpu.dot_dimension_numbers<[2], [1], [1], [2], [0, 0, 0, 1, 1, 2], [0], [0]>} : vector<1x8x8xbf16>, vector<1x8x8xbf16>, vector<1x8x8xf32> -> vector<1x8x8xf32>
    "tpu.trace_stop"() : () -> ()
    %319 = vector.extract_strided_slice %11 {offsets = [0, 0, 3], sizes = [1, 8, 1], strides = [1, 1, 1]} : vector<1x8x4xf32> to vector<1x8x1xf32>
    %320 = vector.broadcast %319 : vector<1x8x1xf32> to vector<1x8x8xf32>
    %321 = arith.addf %21, %320 : vector<1x8x8xf32>
    %322 = vector.extract_strided_slice %14 {offsets = [0, 3, 0], sizes = [1, 1, 8], strides = [1, 1, 1]} : vector<1x4x8xf32> to vector<1x1x8xf32>
    %323 = vector.broadcast %322 : vector<1x1x8xf32> to vector<1x8x8xf32>
    %324 = arith.addf %321, %323 : vector<1x8x8xf32>
    %325 = vector.extract_strided_slice %9 {offsets = [0, 0, 24], sizes = [1, 8, 1], strides = [1, 1, 1]} : vector<1x8x32xf32> to vector<1x8x1xf32>
    %326 = vector.extract_strided_slice %13 {offsets = [0, 24, 0], sizes = [1, 1, 8], strides = [1, 1, 1]} : vector<1x32x8xf32> to vector<1x1x8xf32>
    %327 = vector.broadcast %325 : vector<1x8x1xf32> to vector<1x8x8xf32>
    %328 = vector.broadcast %326 : vector<1x1x8xf32> to vector<1x8x8xf32>
    %329 = arith.addf %327, %328 : vector<1x8x8xf32>
    %c24 = arith.constant 24 : index
    %330 = memref.load %arg5[%c24] : memref<32xf32, #tpu.memory_space<smem>>
    %331 = math.absf %329 : vector<1x8x8xf32>
    %332 = vector.broadcast %330 : f32 to vector<1x8x8xf32>
    %333 = arith.mulf %332, %331 : vector<1x8x8xf32>
    %334 = arith.addf %324, %333 : vector<1x8x8xf32>
    %335 = vector.extract_strided_slice %9 {offsets = [0, 0, 25], sizes = [1, 8, 1], strides = [1, 1, 1]} : vector<1x8x32xf32> to vector<1x8x1xf32>
    %336 = vector.extract_strided_slice %13 {offsets = [0, 25, 0], sizes = [1, 1, 8], strides = [1, 1, 1]} : vector<1x32x8xf32> to vector<1x1x8xf32>
    %337 = vector.broadcast %335 : vector<1x8x1xf32> to vector<1x8x8xf32>
    %338 = vector.broadcast %336 : vector<1x1x8xf32> to vector<1x8x8xf32>
    %339 = arith.addf %337, %338 : vector<1x8x8xf32>
    %c25 = arith.constant 25 : index
    %340 = memref.load %arg5[%c25] : memref<32xf32, #tpu.memory_space<smem>>
    %341 = math.absf %339 : vector<1x8x8xf32>
    %342 = vector.broadcast %340 : f32 to vector<1x8x8xf32>
    %343 = arith.mulf %342, %341 : vector<1x8x8xf32>
    %344 = arith.addf %334, %343 : vector<1x8x8xf32>
    %345 = vector.extract_strided_slice %9 {offsets = [0, 0, 26], sizes = [1, 8, 1], strides = [1, 1, 1]} : vector<1x8x32xf32> to vector<1x8x1xf32>
    %346 = vector.extract_strided_slice %13 {offsets = [0, 26, 0], sizes = [1, 1, 8], strides = [1, 1, 1]} : vector<1x32x8xf32> to vector<1x1x8xf32>
    %347 = vector.broadcast %345 : vector<1x8x1xf32> to vector<1x8x8xf32>
    %348 = vector.broadcast %346 : vector<1x1x8xf32> to vector<1x8x8xf32>
    %349 = arith.addf %347, %348 : vector<1x8x8xf32>
    %c26 = arith.constant 26 : index
    %350 = memref.load %arg5[%c26] : memref<32xf32, #tpu.memory_space<smem>>
    %351 = math.absf %349 : vector<1x8x8xf32>
    %352 = vector.broadcast %350 : f32 to vector<1x8x8xf32>
    %353 = arith.mulf %352, %351 : vector<1x8x8xf32>
    %354 = arith.addf %344, %353 : vector<1x8x8xf32>
    %355 = vector.extract_strided_slice %9 {offsets = [0, 0, 27], sizes = [1, 8, 1], strides = [1, 1, 1]} : vector<1x8x32xf32> to vector<1x8x1xf32>
    %356 = vector.extract_strided_slice %13 {offsets = [0, 27, 0], sizes = [1, 1, 8], strides = [1, 1, 1]} : vector<1x32x8xf32> to vector<1x1x8xf32>
    %357 = vector.broadcast %355 : vector<1x8x1xf32> to vector<1x8x8xf32>
    %358 = vector.broadcast %356 : vector<1x1x8xf32> to vector<1x8x8xf32>
    %359 = arith.addf %357, %358 : vector<1x8x8xf32>
    %c27 = arith.constant 27 : index
    %360 = memref.load %arg5[%c27] : memref<32xf32, #tpu.memory_space<smem>>
    %361 = math.absf %359 : vector<1x8x8xf32>
    %362 = vector.broadcast %360 : f32 to vector<1x8x8xf32>
    %363 = arith.mulf %362, %361 : vector<1x8x8xf32>
    %364 = arith.addf %354, %363 : vector<1x8x8xf32>
    %365 = vector.extract_strided_slice %9 {offsets = [0, 0, 28], sizes = [1, 8, 1], strides = [1, 1, 1]} : vector<1x8x32xf32> to vector<1x8x1xf32>
    %366 = vector.extract_strided_slice %13 {offsets = [0, 28, 0], sizes = [1, 1, 8], strides = [1, 1, 1]} : vector<1x32x8xf32> to vector<1x1x8xf32>
    %367 = vector.broadcast %365 : vector<1x8x1xf32> to vector<1x8x8xf32>
    %368 = vector.broadcast %366 : vector<1x1x8xf32> to vector<1x8x8xf32>
    %369 = arith.addf %367, %368 : vector<1x8x8xf32>
    %c28 = arith.constant 28 : index
    %370 = memref.load %arg5[%c28] : memref<32xf32, #tpu.memory_space<smem>>
    %371 = math.absf %369 : vector<1x8x8xf32>
    %372 = vector.broadcast %370 : f32 to vector<1x8x8xf32>
    %373 = arith.mulf %372, %371 : vector<1x8x8xf32>
    %374 = arith.addf %364, %373 : vector<1x8x8xf32>
    %375 = vector.extract_strided_slice %9 {offsets = [0, 0, 29], sizes = [1, 8, 1], strides = [1, 1, 1]} : vector<1x8x32xf32> to vector<1x8x1xf32>
    %376 = vector.extract_strided_slice %13 {offsets = [0, 29, 0], sizes = [1, 1, 8], strides = [1, 1, 1]} : vector<1x32x8xf32> to vector<1x1x8xf32>
    %377 = vector.broadcast %375 : vector<1x8x1xf32> to vector<1x8x8xf32>
    %378 = vector.broadcast %376 : vector<1x1x8xf32> to vector<1x8x8xf32>
    %379 = arith.addf %377, %378 : vector<1x8x8xf32>
    %c29 = arith.constant 29 : index
    %380 = memref.load %arg5[%c29] : memref<32xf32, #tpu.memory_space<smem>>
    %381 = math.absf %379 : vector<1x8x8xf32>
    %382 = vector.broadcast %380 : f32 to vector<1x8x8xf32>
    %383 = arith.mulf %382, %381 : vector<1x8x8xf32>
    %384 = arith.addf %374, %383 : vector<1x8x8xf32>
    %385 = vector.extract_strided_slice %9 {offsets = [0, 0, 30], sizes = [1, 8, 1], strides = [1, 1, 1]} : vector<1x8x32xf32> to vector<1x8x1xf32>
    %386 = vector.extract_strided_slice %13 {offsets = [0, 30, 0], sizes = [1, 1, 8], strides = [1, 1, 1]} : vector<1x32x8xf32> to vector<1x1x8xf32>
    %387 = vector.broadcast %385 : vector<1x8x1xf32> to vector<1x8x8xf32>
    %388 = vector.broadcast %386 : vector<1x1x8xf32> to vector<1x8x8xf32>
    %389 = arith.addf %387, %388 : vector<1x8x8xf32>
    %c30 = arith.constant 30 : index
    %390 = memref.load %arg5[%c30] : memref<32xf32, #tpu.memory_space<smem>>
    %391 = math.absf %389 : vector<1x8x8xf32>
    %392 = vector.broadcast %390 : f32 to vector<1x8x8xf32>
    %393 = arith.mulf %392, %391 : vector<1x8x8xf32>
    %394 = arith.addf %384, %393 : vector<1x8x8xf32>
    %395 = vector.extract_strided_slice %9 {offsets = [0, 0, 31], sizes = [1, 8, 1], strides = [1, 1, 1]} : vector<1x8x32xf32> to vector<1x8x1xf32>
    %396 = vector.extract_strided_slice %13 {offsets = [0, 31, 0], sizes = [1, 1, 8], strides = [1, 1, 1]} : vector<1x32x8xf32> to vector<1x1x8xf32>
    %397 = vector.broadcast %395 : vector<1x8x1xf32> to vector<1x8x8xf32>
    %398 = vector.broadcast %396 : vector<1x1x8xf32> to vector<1x8x8xf32>
    %399 = arith.addf %397, %398 : vector<1x8x8xf32>
    %c31 = arith.constant 31 : index
    %400 = memref.load %arg5[%c31] : memref<32xf32, #tpu.memory_space<smem>>
    %401 = math.absf %399 : vector<1x8x8xf32>
    %402 = vector.broadcast %400 : f32 to vector<1x8x8xf32>
    %403 = arith.mulf %402, %401 : vector<1x8x8xf32>
    %404 = arith.addf %394, %403 : vector<1x8x8xf32>
    %cst_22 = arith.constant dense<0xFF800000> : vector<1x8xf32>
    %405 = vector.multi_reduction <maximumf>, %404, %cst_22 [2] : vector<1x8x8xf32> to vector<1x8xf32>
    %406 = vector.shape_cast %405 : vector<1x8xf32> to vector<1x8x1xf32>
    %407 = vector.broadcast %406 : vector<1x8x1xf32> to vector<1x8x8xf32>
    %408 = arith.subf %404, %407 : vector<1x8x8xf32>
    %409 = math.exp %408 : vector<1x8x8xf32>
    %cst_23 = arith.constant dense<0.000000e+00> : vector<1x8xf32>
    %410 = vector.multi_reduction <add>, %409, %cst_23 [2] : vector<1x8x8xf32> to vector<1x8xf32>
    %411 = vector.shape_cast %410 : vector<1x8xf32> to vector<1x8x1xf32>
    %412 = tpu.reciprocal %411 {approx = true} : vector<1x8x1xf32> -> vector<1x8x1xf32>
    %413 = vector.broadcast %412 : vector<1x8x1xf32> to vector<1x8x8xf32>
    %414 = arith.mulf %409, %413 : vector<1x8x8xf32>
    %415 = arith.truncf %414 : vector<1x8x8xf32> to vector<1x8x8xbf16>
    %416 = vector.extract_strided_slice %15 {offsets = [0, 0, 24], sizes = [1, 8, 8], strides = [1, 1, 1]} : vector<1x8x32xbf16> to vector<1x8x8xbf16>
    "tpu.trace_start"() <{level = 10 : i32, message = "bij,bjd->bid"}> : () -> ()
    %cst_24 = arith.constant dense<0.000000e+00> : vector<1x8x8xf32>
    %417 = tpu.matmul %415, %416, %cst_24 {dimension_numbers = #tpu.dot_dimension_numbers<[2], [1], [1], [2], [0, 0, 0, 1, 1, 2], [0], [0]>} : vector<1x8x8xbf16>, vector<1x8x8xbf16>, vector<1x8x8xf32> -> vector<1x8x8xf32>
    "tpu.trace_stop"() : () -> ()
    %418 = tpu.concatenate %120, %219, %318, %417 in 2 : vector<1x8x8xf32>, vector<1x8x8xf32>, vector<1x8x8xf32>, vector<1x8x8xf32> -> vector<1x8x32xf32>
    %419 = arith.addf %9, %418 : vector<1x8x32xf32>
    %cst_25 = arith.constant dense<0.000000e+00> : vector<1x8xf32>
    %420 = vector.multi_reduction <add>, %419, %cst_25 [2] : vector<1x8x32xf32> to vector<1x8xf32>
    %421 = vector.shape_cast %420 : vector<1x8xf32> to vector<1x8x1xf32>
    %cst_26 = arith.constant 3.200000e+01 : f32
    %422 = vector.broadcast %cst_26 : f32 to vector<1x8x1xf32>
    %423 = arith.divf %421, %422 : vector<1x8x1xf32>
    %424 = vector.broadcast %423 : vector<1x8x1xf32> to vector<1x8x32xf32>
    %425 = arith.subf %419, %424 : vector<1x8x32xf32>
    %426 = arith.mulf %425, %425 : vector<1x8x32xf32>
    %cst_27 = arith.constant dense<0.000000e+00> : vector<1x8xf32>
    %427 = vector.multi_reduction <add>, %426, %cst_27 [2] : vector<1x8x32xf32> to vector<1x8xf32>
    %428 = vector.shape_cast %427 : vector<1x8xf32> to vector<1x8x1xf32>
    %cst_28 = arith.constant 3.200000e+01 : f32
    %429 = vector.broadcast %cst_28 : f32 to vector<1x8x1xf32>
    %430 = arith.divf %428, %429 : vector<1x8x1xf32>
    %431 = vector.broadcast %423 : vector<1x8x1xf32> to vector<1x8x32xf32>
    %432 = arith.subf %419, %431 : vector<1x8x32xf32>
    %cst_29 = arith.constant 9.99999974E-6 : f32
    %433 = vector.broadcast %cst_29 : f32 to vector<1x8x1xf32>
    %434 = arith.addf %430, %433 : vector<1x8x1xf32>
    %435 = math.rsqrt %434 : vector<1x8x1xf32>
    %436 = vector.broadcast %435 : vector<1x8x1xf32> to vector<1x8x32xf32>
    %437 = arith.mulf %432, %436 : vector<1x8x32xf32>
    %c0_30 = arith.constant 0 : index
    %c0_31 = arith.constant 0 : index
    %438 = vector.load %arg6[%c0_30, %c0_31] : memref<1x32xf32, #tpu.memory_space<vmem>>, vector<1x32xf32>
    %439 = vector.shape_cast %438 : vector<1x32xf32> to vector<32xf32>
    %440 = vector.shape_cast %439 : vector<32xf32> to vector<1x1x32xf32>
    %441 = vector.broadcast %440 : vector<1x1x32xf32> to vector<1x8x32xf32>
    %442 = arith.mulf %437, %441 : vector<1x8x32xf32>
    %c0_32 = arith.constant 0 : index
    %c0_33 = arith.constant 0 : index
    %443 = vector.load %arg7[%c0_32, %c0_33] : memref<1x32xf32, #tpu.memory_space<vmem>>, vector<1x32xf32>
    %444 = vector.shape_cast %443 : vector<1x32xf32> to vector<32xf32>
    %445 = vector.shape_cast %444 : vector<32xf32> to vector<1x1x32xf32>
    %446 = vector.broadcast %445 : vector<1x1x32xf32> to vector<1x8x32xf32>
    %447 = arith.addf %442, %446 : vector<1x8x32xf32>
    %cst_34 = arith.constant 0.000000e+00 : f32
    %448 = vector.broadcast %cst_34 : f32 to vector<1x8x32xf32>
    %449 = arith.maximumf %447, %448 : vector<1x8x32xf32>
    %450 = vector.extract_strided_slice %449 {offsets = [0, 0, 0], sizes = [1, 1, 32], strides = [1, 1, 1]} : vector<1x8x32xf32> to vector<1x1x32xf32>
    %451 = vector.shape_cast %450 : vector<1x1x32xf32> to vector<1x32xf32>
    %452 = vector.extract_strided_slice %449 {offsets = [0, 1, 0], sizes = [1, 1, 32], strides = [1, 1, 1]} : vector<1x8x32xf32> to vector<1x1x32xf32>
    %453 = vector.shape_cast %452 : vector<1x1x32xf32> to vector<1x32xf32>
    %454 = vector.extract_strided_slice %449 {offsets = [0, 2, 0], sizes = [1, 1, 32], strides = [1, 1, 1]} : vector<1x8x32xf32> to vector<1x1x32xf32>
    %455 = vector.shape_cast %454 : vector<1x1x32xf32> to vector<1x32xf32>
    %456 = vector.extract_strided_slice %449 {offsets = [0, 3, 0], sizes = [1, 1, 32], strides = [1, 1, 1]} : vector<1x8x32xf32> to vector<1x1x32xf32>
    %457 = vector.shape_cast %456 : vector<1x1x32xf32> to vector<1x32xf32>
    %458 = vector.extract_strided_slice %449 {offsets = [0, 4, 0], sizes = [1, 1, 32], strides = [1, 1, 1]} : vector<1x8x32xf32> to vector<1x1x32xf32>
    %459 = vector.shape_cast %458 : vector<1x1x32xf32> to vector<1x32xf32>
    %460 = vector.extract_strided_slice %449 {offsets = [0, 5, 0], sizes = [1, 1, 32], strides = [1, 1, 1]} : vector<1x8x32xf32> to vector<1x1x32xf32>
    %461 = vector.shape_cast %460 : vector<1x1x32xf32> to vector<1x32xf32>
    %462 = vector.extract_strided_slice %449 {offsets = [0, 6, 0], sizes = [1, 1, 32], strides = [1, 1, 1]} : vector<1x8x32xf32> to vector<1x1x32xf32>
    %463 = vector.shape_cast %462 : vector<1x1x32xf32> to vector<1x32xf32>
    %464 = vector.extract_strided_slice %449 {offsets = [0, 7, 0], sizes = [1, 1, 32], strides = [1, 1, 1]} : vector<1x8x32xf32> to vector<1x1x32xf32>
    %465 = vector.shape_cast %464 : vector<1x1x32xf32> to vector<1x32xf32>
    %466 = tpu.concatenate %451, %453, %455, %457, %459, %461, %463, %465 in 1 : vector<1x32xf32>, vector<1x32xf32>, vector<1x32xf32>, vector<1x32xf32>, vector<1x32xf32>, vector<1x32xf32>, vector<1x32xf32>, vector<1x32xf32> -> vector<1x256xf32>
    %c0_35 = arith.constant 0 : index
    %c0_36 = arith.constant 0 : index
    %c0_37 = arith.constant 0 : index
    %467 = vector.load %arg8[%c0_35, %c0_36, %c0_37] : memref<1x1x256xf32, #tpu.memory_space<vmem>>, vector<1x1x256xf32>
    %468 = vector.shape_cast %467 : vector<1x1x256xf32> to vector<1x256xf32>
    %469 = vector.shape_cast %466 : vector<1x256xf32> to vector<1x1x256xf32>
    tpu.vector_store %arg8[%c0_35, %c0_36, %c0_37], %469 {strides = array<i32>} : memref<1x1x256xf32, #tpu.memory_space<vmem>>, vector<1x1x256xf32>,
    return
  }
  func.func @transform_0(%arg0: i32) -> (i32, i32, i32) {
    %c0_i32 = arith.constant 0 : i32
    %c0_i32_0 = arith.constant 0 : i32
    %c0_i32_1 = arith.constant 0 : i32
    return %arg0, %c0_i32, %c0_i32_0 : i32, i32, i32
  }
  func.func @transform_1(%arg0: i32) -> (i32, i32, i32) {
    %c0_i32 = arith.constant 0 : i32
    %c0_i32_0 = arith.constant 0 : i32
    %c0_i32_1 = arith.constant 0 : i32
    return %arg0, %c0_i32, %c0_i32_0 : i32, i32, i32
  }
  func.func @transform_2(%arg0: i32) -> (i32, i32) {
    %c0_i32 = arith.constant 0 : i32
    %c0_i32_0 = arith.constant 0 : i32
    %c0_i32_1 = arith.constant 0 : i32
    return %c0_i32, %c0_i32_0 : i32, i32
  }
  func.func @transform_3(%arg0: i32) -> (i32, i32) {
    %c0_i32 = arith.constant 0 : i32
    %c0_i32_0 = arith.constant 0 : i32
    %c0_i32_1 = arith.constant 0 : i32
    return %c0_i32, %c0_i32_0 : i32, i32
  }
  func.func @transform_4(%arg0: i32) -> i32 {
    %c0_i32 = arith.constant 0 : i32
    %c0_i32_0 = arith.constant 0 : i32
    return %c0_i32 : i32
  }
  func.func @transform_5(%arg0: i32) -> (i32, i32) {
    %c0_i32 = arith.constant 0 : i32
    %c0_i32_0 = arith.constant 0 : i32
    %c0_i32_1 = arith.constant 0 : i32
    return %c0_i32, %c0_i32_0 : i32, i32
  }
  func.func @transform_6(%arg0: i32) -> (i32, i32) {
    %c0_i32 = arith.constant 0 : i32
    %c0_i32_0 = arith.constant 0 : i32
    %c0_i32_1 = arith.constant 0 : i32
    return %c0_i32, %c0_i32_0 : i32, i32
  }
  func.func @transform_7(%arg0: i32) -> (i32, i32, i32) {
    %c0_i32 = arith.constant 0 : i32
    %c0_i32_0 = arith.constant 0 : i32
    %c0_i32_1 = arith.constant 0 : i32
    return %arg0, %c0_i32, %c0_i32_0 : i32, i32, i32
  }
}

</mosaic_0001>

<bundles_post_ra>
// kernel: tpu_custom_call.1
= control target key start
LH: loop header
LB: loop body
LE: loop exit
PB: predicated region body
PF: predicated region fallthrough
CT: control target
= control target key end

     0   :  { %s2935_s0 = inlined_call_operand.hbm [shape: bf16[2,8,32], index: 0, kind: input, shape index: {}]   ;;  %s2936_s1 = inlined_call_operand.hbm [shape: f32[2,8,8], index: 1, kind: input, shape index: {}]   ;;  %s2937_s2 = inlined_call_operand.hbm [shape: bf16[32,640], index: 2, kind: input, shape index: {}]   ;;  %s2938_s3 = inlined_call_operand.vmem [shape: f32[1,640], index: 3, kind: input, shape index: {}]   ;;  %s2939_s4 = inlined_call_operand.vmem [shape: f32[32], index: 4, kind: input, shape index: {}]   ;;  %s2940_s5 = inlined_call_operand.vmem [shape: f32[1,32], index: 5, kind: input, shape index: {}]   ;;  %s2941_s6 = inlined_call_operand.vmem [shape: f32[1,32], index: 6, kind: input, shape index: {}]   ;;  %s2942_s7 = inlined_call_operand.hbm [shape: f32[2,1,256], index: 7, kind: output, shape index: {}]  }
   0x1   :  { %2965 = sst [smem:[#allocation29_spill]] %s2935_s0 }
   0x2   :  { %2966 = sst [smem:[#allocation30_spill]] %s2936_s1 }
   0x3   :  { %2967 = sst [smem:[#allocation31_spill]] %s2937_s2 }
   0x4   :  { %2968 = sst [smem:[#allocation32_spill]] %s2938_s3 }
   0x5   :  { %2969 = sst [smem:[#allocation33_spill]] %s2939_s4 }
   0x6   :  { %2970 = sst [smem:[#allocation34_spill]] %s2942_s7 }
   0x7   :  { %12 = vsyncpa [#allocation3], 0 }
   0x8   :  { %14 = vsyncpa [#allocation3 + $0x1], 0 }
   0x9   :  { %15 = vsyncpa [#allocation7], 0 }
   0xa   :  { %17 = vsyncpa [#allocation7 + $0x1], 0 }
   0xb   :  { %18 = vsyncpa [#allocation5], 0 }
   0xc   :  { %19 = vsyncpa [#allocation4], 0 }
   0xd   :  { %21 = vsyncpa [#allocation4 + $0x1], 0  ;;  %s2186_s24 = smov 0   ;;  %s2188_s25 = smov 0  }
   0xe   :  { %s2190_s26 = smov 0   ;;  %s2192_s27 = smov 0  }
   0xf LB: > { %2971 = sst [smem:[#allocation16_spill]] %s2081_s24  ;;  %s2207_s28 = sadd.s32 4294967295, %s2093_s27   ;;  %s2093_s27 = sphi %s2192_s27, %s3046_s27   ;;  %s2089_s26 = sphi %s2190_s26, %s3049_s26   ;;  %s2085_s25 = sphi %s2188_s25, %s3048_s25   ;;  %s2081_s24 = sphi %s2186_s24, %s3047_s24  }
  0x10   : > { %2972 = sst [smem:[#allocation17_spill]] %s2085_s25  ;;  %s1613_s29 = sadd.s32 4294967294, %s2093_s27  }
  0x11   : > { %2973 = sst [smem:[#allocation18_spill]] %s2089_s26  ;;  %p47_p0 = scmp.ne.s32.totalorder %s2085_s25, %s2081_s24 }
  0x12   : > { %2974 = sst [smem:[#allocation19_spill]] %s2093_s27  ;;  %p2943_p1 = scmp.eq.s32.totalorder %s2207_s28, 0 }
  0x13   : > { %2975 = sst [smem:[#allocation20_spill]] %s2207_s28  ;;  %p208_p3 = scmp.eq.s32.totalorder %s1613_s29, 1 }
  0x14   : > { %p2216_p4 = por %p2943_p1, %p47_p0  ;;  %p1614_p5 = scmp.ge.s32.totalorder %s2093_s27, 1 }
  0x15   : > { %p2221_p6 = por %p208_p3, %p47_p0  ;;  %p215_p7 = scmp.lt.s32.totalorder %s2093_s27, 3 }
  0x16   : > { %s2976_s30 = scalar_select %p2216_p4, 1, 0 }
  0x17   : > { %s2977_s8 = scalar_select %p2221_p6, 1, 0 }
  0x18   : > { %p2226_p8 = pnand %p1614_p5, %p215_p7  ;;  %s2095_s10 = smov [#allocation8]  }
  0x19   : > { %2978 = sst [smem:[#allocation21_spill]] %s2977_s8  ;;  %s227_s11 = sshll.u32 %s2095_s10, 4  ;;  %s228_s11 = int_to_ptr.vmem [resolvable:$true] %s227_s11 }
  0x1a   : > { %s2979_s9 = scalar_select %p2226_p8, 1, 0 }
  0x1b   : > { %p1741_p9 = pneg %p2226_p8  ;;  %s2980_s4 = sld [smem:[#allocation33_spill]] }
  0x1c   : > { %s2982_s2 = sld [smem:[#allocation31_spill]] }
  0x1d   : > { %p2238_p11 = pnand %p1741_p9, %p2943_p1 }
  0x1f   : > { %p1914_p13 = pneg %p2238_p11 }
  0x21   : > { %s244_s14 = sshll.u32 %s2980_s4, 4  ;;  %s2242_s14 = int_to_ptr.vmem [resolvable:$true] %s244_s14 }
  0x22   : > { %s1912_s18 = scalar_lea.hbm %s2982_s2, 1280 }
  0x23   : > { %p1913_p12 = scmp.ne.s32.totalorder %s2982_s2, %s1912_s18  ;;  %p1919_p5 = scmp.lt.u32.totalorder %s1912_s18, %s2982_s2 }
  0x25   : > { %p1915_p0 = pnand %p1914_p13, %p1913_p12 }
  0x27   : > { %p1916_p3 = pneg %p1915_p0 }
  0x29   : > { %p1921_p7 = pnand %p1919_p5, %p1916_p3 }
  0x2b   : > { %1924 = shalt.err (!%p1921_p7)
}
  0x2c   : > { %s1925_s23 = scalar_lea.vmem %s228_s11, 1280  ;;  %p1933_p2 = scmp.lt.s32.totalorder %s228_s11, %s228_s11 }
  0x2d   : > { %p1926_p9 = scmp.ne.s32.totalorder %s228_s11, %s1925_s23  ;;  %p1934_p6 = scmp.lt.s32.totalorder %s1925_s23, %s1925_s23 }
  0x2f   : > { %p1928_p10 = pnand %p1926_p9, %p1914_p13  ;;  %p1935_p4 = por %p1934_p6, %p1933_p2 }
  0x31   : > { %p1929_p1 = pneg %p1928_p10 }
  0x33   : > { %p1936_p8 = pnand %p1935_p4, %p1929_p1 }
  0x35   : > { %1939 = shalt.err (!%p1936_p8)
}
  0x36   : > { %s2096_s29 = smov 320   ;;  %s2097_s10 = smov 20  }
  0x37   : > { %1744 = dma.hbm_to_vmem [thread:$0]  (!%p2238_p11), %s2982_s2, 1280, %s228_s11, [#allocation7], %s2096_s29, %s2096_s29, %s2097_s10  }
  0x38   : > { %s1940_s16 = scalar_lea.vmem %s2242_s14, 16  ;;  %p1948_p1 = scmp.lt.s32.totalorder %s2242_s14, %s2242_s14 }
  0x39   : > { %p1941_p12 = scmp.ne.s32.totalorder %s2242_s14, %s1940_s16  ;;  %p1949_p4 = scmp.lt.s32.totalorder %s1940_s16, %s1940_s16 }
  0x3b   : > { %p1943_p10 = pnand %p1941_p12, %p1914_p13  ;;  %p1950_p6 = por %p1949_p4, %p1948_p1 }
  0x3d   : > { %p1944_p2 = pneg %p1943_p10 }
  0x3f   : > { %p1951_p8 = pnand %p1950_p6, %p1944_p2 }
  0x41   : > { %1954 = shalt.err (!%p1951_p8)
}
  0x42   : > { %s2098_s17 = smov [#allocation9]   ;;  %s2277_s11 = sadd.s32 1, %s2093_s27  }
  0x43   : > { %1747 = dma.vmem_to_smem (!%p2238_p11), %s2242_s14, 16, %s2098_s17, [#allocation5]  }
  0x44   : > { %2983 = sst [smem:[#allocation22_spill]] %s2277_s11  ;;  %s34_s18 = sadd.s32 1, %s2089_s26 }
  0x45   : > { %s31_s19 = ssub.s32 %s2093_s27, %s2277_s11  ;;  %p41_p13 = scmp.ne.s32.totalorder %s2089_s26, %s2085_s25 }
  0x46   : > { %p32_p0 = scmp.eq.s32.totalorder %s31_s19, 0  ;;  %p42_p3 = scmp.eq.s32.totalorder %s2093_s27, 0 }
  0x47   : > { %p2984_p5 = scmp.eq.s32.totalorder %s2207_s28, 1  ;;  %p1761_p9 = scmp.lt.s32.totalorder %s2093_s27, 2 }
  0x48   : > { %s2293_s20 = scalar_select %p32_p0, %s2089_s26, %s34_s18  }
  0x49   : > { %p2287_p7 = por %p2984_p5, %p41_p13  ;;  %p43_p12 = por %p42_p3, %p41_p13 }
  0x4a   : > { %2987 = sst [smem:[#allocation24_spill]] %s2293_s20  ;;  %s2296_s21 = sand.u32 1, %s2089_s26  }
  0x4b   : > { %s2985_s15 = scalar_select %p2287_p7, 1, 0 }
  0x4c   : > { %s1618_s14 = sshll.u32 %s2296_s21, 2  ;;  %s1619_s22 = sshll.u32 %s2093_s27, 6 }
  0x4d   : > { %2986 = sst [smem:[#allocation23_spill]] %s2985_s15  ;;  %s2988_s0 = sld [smem:[#allocation29_spill]] }
  0x4e   : > { %s265_s12 = scalar_lea.vmem [#allocation2], %s1618_s14  ;;  %p2307_p11 = pnand %p1761_p9, %p43_p12 }
  0x4f   : > { %s272_s13 = sshll.u32 %s265_s12, 4  ;;  %s1620_s18 = sshll.u32 %s2296_s21, 3  ;;  %s2305_s13 = int_to_ptr.vmem [resolvable:$true] %s272_s13 }
  0x50   : > { %s262_s19 = scalar_lea.sflag [#allocation3], %s2296_s21  ;;  %p1957_p2 = pneg %p2307_p11 }
  0x53   : > { %s2303_s10 = scalar_lea.hbm %s2988_s0, %s1619_s22  ;;  %s1960_s29 = scalar_lea.hbm %s2988_s0, 128 }
  0x54   : > { %s1955_s23 = scalar_lea.hbm %s2303_s10, 64  ;;  %p1961_p6 = scmp.lt.u32.totalorder %s2303_s10, %s2988_s0 }
  0x55   : > { %p1956_p10 = scmp.ne.s32.totalorder %s2303_s10, %s1955_s23  ;;  %p1962_p8 = scmp.lt.u32.totalorder %s1960_s29, %s1955_s23 }
  0x56   : > { %p1964_p0 = scmp.lt.u32.totalorder %s1955_s23, %s2303_s10 }
  0x57   : > { %p1958_p1 = pnand %p1957_p2, %p1956_p10  ;;  %p1963_p13 = por %p1962_p8, %p1961_p6 }
  0x59   : > { %p1959_p4 = pneg %p1958_p1  ;;  %p1965_p3 = por %p1964_p0, %p1963_p13 }
  0x5b   : > { %p1966_p5 = pnand %p1965_p3, %p1959_p4 }
  0x5d   : > { %1969 = shalt.err (!%p1966_p5)
}
  0x5e   : > { %s1970_s17 = scalar_lea.vmem %s2305_s13, 64  ;;  %s2099_s14 = smov [#allocation2]  }
  0x5f   : > { %p1971_p9 = scmp.ne.s32.totalorder %s2305_s13, %s1970_s17  ;;  %s1975_s22 = sshll.u32 %s2099_s14, 4  ;;  %s1976_s22 = int_to_ptr.vmem [resolvable:$false] %s1975_s22 }
  0x60   : > { %s1977_s2 = scalar_lea.vmem %s1976_s22, 128  ;;  %p1978_p1 = scmp.lt.s32.totalorder %s2305_s13, %s1976_s22 }
  0x61   : > { %p1973_p12 = pnand %p1971_p9, %p1957_p2  ;;  %p1979_p6 = scmp.lt.s32.totalorder %s1977_s2, %s1970_s17 }
  0x63   : > { %p1974_p10 = pneg %p1973_p12  ;;  %p1980_p8 = por %p1979_p6, %p1978_p1 }
  0x65   : > { %p1981_p13 = pnand %p1980_p8, %p1974_p10 }
  0x67   : > { %1984 = shalt.err (!%p1981_p13)
}
  0x68   : > { %1751 = dma.hbm_to_vmem [thread:$0]  (!%p2307_p11), %s2303_s10, 64, %s2305_s13, %s262_s19  }
  0x69   : > { %s1621_s23 = sshll.u32 %s2093_s27, 7  ;;  %s2990_s1 = sld [smem:[#allocation30_spill]] }
  0x6a   : > { %s283_s17 = scalar_lea.vmem [#allocation6], %s1620_s18  ;;  %s2991_s2 = sand.u32 1, %s2093_s27  }
  0x6b   : > { %s290_s22 = sshll.u32 %s283_s17, 4  ;;  %s280_s0 = scalar_lea.sflag [#allocation7], %s2991_s2  ;;  %s291_s22 = int_to_ptr.vmem [resolvable:$true] %s290_s22 }
  0x6f   : > { %s2343_s14 = scalar_lea.hbm %s2990_s1, %s1621_s23  ;;  %s1990_s19 = scalar_lea.hbm %s2990_s1, 256 }
  0x70   : > { %s1985_s4 = scalar_lea.hbm %s2343_s14, 128  ;;  %p1991_p5 = scmp.lt.u32.totalorder %s2343_s14, %s2990_s1 }
  0x71   : > { %p1986_p4 = scmp.ne.s32.totalorder %s2343_s14, %s1985_s4  ;;  %p1992_p9 = scmp.lt.u32.totalorder %s1990_s19, %s1985_s4 }
  0x72   : > { %p1994_p10 = scmp.lt.u32.totalorder %s1985_s4, %s2343_s14 }
  0x73   : > { %p1988_p0 = pnand %p1986_p4, %p1957_p2  ;;  %p1993_p12 = por %p1992_p9, %p1991_p5 }
  0x75   : > { %p1989_p3 = pneg %p1988_p0  ;;  %p1995_p1 = por %p1994_p10, %p1993_p12 }
  0x77   : > { %p1996_p6 = pnand %p1995_p1, %p1989_p3 }
  0x79   : > { %1999 = shalt.err (!%p1996_p6)
}
  0x7a   : > { %s2000_s18 = scalar_lea.vmem %s291_s22, 128  ;;  %s2100_s29 = smov [#allocation6]  }
  0x7b   : > { %p2001_p8 = scmp.ne.s32.totalorder %s291_s22, %s2000_s18  ;;  %s2005_s12 = sshll.u32 %s2100_s29, 4  ;;  %s2006_s12 = int_to_ptr.vmem [resolvable:$false] %s2005_s12 }
  0x7c   : > { %s2007_s17 = scalar_lea.vmem %s2006_s12, 256  ;;  %p2008_p0 = scmp.lt.s32.totalorder %s291_s22, %s2006_s12 }
  0x7d   : > { %p2003_p13 = pnand %p2001_p8, %p1957_p2  ;;  %p2009_p7 = scmp.lt.s32.totalorder %s2007_s17, %s2000_s18 }
  0x7f   : > { %p2004_p4 = pneg %p2003_p13  ;;  %p2010_p5 = por %p2009_p7, %p2008_p0 }
  0x81   : > { %p2011_p9 = pnand %p2010_p5, %p2004_p4 }
  0x83   : > { %2014 = shalt.err (!%p2011_p9)
}
  0x84   : > { %1754 = dma.hbm_to_vmem [thread:$0]  (!%p2307_p11), %s2343_s14, 128, %s291_s22, %s280_s0  }
  0x85   : > { %p2992_p3 = scmp.ne.s32.totalorder %s2979_s9, 0 }
  0x87   : > { %299 = sbr.rel (%p2992_p3) target bundleno = 1860 (0x744), region = 48 }
  0x8e   : > { %s2371_s4 = sand.u32 1, %s2085_s25   ;;  %p2993_p7 = scmp.ne.s32.totalorder %s2976_s30, 0 }
  0x8f   : > { %s1623_s2 = sshll.u32 %s2371_s4, 2  ;;  %s302_s10 = scalar_lea.sflag [#allocation3], %s2371_s4 }
  0x90   : > { %s2375_s13 = scalar_lea.vmem [#allocation2], %s1623_s2 }
  0x91   : > { %2060 = dma.done.wait (%p2993_p7), %s302_s10, 64  }
  0x92   : > { %2062 = vsyncadd (%p2993_p7), %s302_s10, 4294967232  ;;  %s310_s0 = sand.u32 1, %s2207_s28   ;;  %s1624_s9 = sshll.u32 %s2371_s4, 3 }
  0x93   : > { %s311_s16 = scalar_lea.sflag [#allocation7], %s310_s0  ;;  %s2383_s14 = scalar_lea.vmem [#allocation6], %s1624_s9 }
  0x94   : > { %2064 = dma.done.wait (%p2993_p7), %s311_s16, 128  }
  0x95   : > { %2066 = vsyncadd (%p2993_p7), %s311_s16, 4294967168  ;;  %p2994_p11 = scmp.eq.s32.totalorder %s2207_s28, 0 }
  0x97   : > { %2068 = dma.done.wait (%p2994_p11), [#allocation7], 1280   ;;  %p2995_p2 = pmov %p2994_p11 }
  0x99   : > { %2070 = vsyncadd (%p2995_p2), [#allocation7], 4294966016  ;;  %p2996_p12 = pmov %p2995_p2 }
  0x9a   : > { %p2997_p10 = pmov %p2995_p2 }
  0x9b   : > { %2072 = dma.done.wait (%p2996_p12), [#allocation5], 16  }
  0x9c   : > { %2074 = vsyncadd (%p2997_p10), [#allocation5], 4294967280 }
  0x9d   : > { %327 = sfence }
  0x9e   : > { %v1880_v0 = vld [vmem:[#allocation8 + $0x4] ss:$20 sps:$4 sm:$0xff]   ;;  %v1882_v1 = vld [vmem:[#allocation8 + $0xc] ss:$20 sps:$4 sm:$0xff]   ;;  %v2101_v2 = vmov 0   ;;  %vm452_vm0 = vcmask 261120   ;;  %v2958_v13 = vlaneseq }
  0x9f   : > { %488 = vmatprep.mubr.bf16.mxu0 %v2101_v2  ;;  %529 = vmatprep.mubr.bf16.mxu1 %v2101_v2  ;;  %v1884_v3 = vld [vmem:[#allocation8] ss:$20 sps:$4 sm:$0xff]   ;;  %v1885_v4 = vld [vmem:[#allocation8 + $0x8] ss:$20 sps:$4 sm:$0xff]   ;;  %v1891_v8 = vld [vmem:[#allocation8 + $0x30] ss:$20 sps:$4 sm:$0xff]  }
  0xa0   : > { %456 = vmatprep.subr.bf16.mxu0 %v1880_v0  ;;  %1847 = vset.pattern.permute.xlu1 %v2101_v2  ;;  %v1886_v5 = vld [vmem:[#allocation8 + $0x2c] ss:$20 sps:$4 sm:$0xff]   ;;  %v1888_v6 = vld [vmem:[#allocation8 + $0x34] ss:$20 sps:$4 sm:$0xff]   ;;  %v1892_v10 = vld [vmem:[#allocation8 + $0x10] ss:$20 sps:$4 sm:$0xff]  }
  0xa1   : > { %497 = vmatprep.subr.bf16.mxu1 %v1882_v1  ;;  %1845 = vset.pattern.permute.xlu0 %v2101_v2  ;;  %v1890_v7 = vld [vmem:[#allocation8 + $0x28] ss:$20 sps:$4 sm:$0xff]   ;;  %v2959_v11 = vmov 0.0   ;;  %v1893_v12 = vld [vmem:[#allocation8 + $0x38] ss:$20 sps:$4 sm:$0xff]   ;;  %vm2103_vm1 = vmmov 0  }
  0xa2   : > { %457 = vmatpush1.bf16.msra.mxu0 %v1884_v3  ;;  %498 = vmatpush1.bf16.msra.mxu1 %v1885_v4  ;;  %v360_v9 = vld [vmem:[%s2375_s13] sm:$0xf]  ;;  %v2412_v14 = vshrl.u32 %v2958_v13, 7  ;;  %s2999_s3 = sld [smem:[#allocation32_spill]]  ;;  %vm786_vm2 = vcmask 1043456   ;;  %v2104_v35 = vmov 1  }
  0xa3   : > { %458 = vmatprep.subr.bf16.mxu0 %v1886_v5  ;;  %499 = vmatprep.subr.bf16.mxu1 %v1888_v6  ;;  %v2105_v36 = vmov 8   ;;  %v2106_v41 = vmov 9   ;;  %v2107_v42 = vmov 2   ;;  %v2108_v43 = vmov 3   ;;  %s2555_s19 = sld [smem:[#allocation9]]  ;;  %s2557_s21 = sld [smem:[#allocation9 + $0x1]] }
  0xa4   : > { %2998 = vst [vmem:[#allocation25_spill] sm:$0xff] %v2412_v14  ;;  %v2415_v15 = vsub.s32 0, %v2412_v14  ;;  %v2418_v16 = vsub.s32 1, %v2412_v14  ;;  %v2421_v17 = vsub.s32 3, %v2412_v14  ;;  %v2109_v44 = vmov 10   ;;  %s2559_s23 = sld [smem:[#allocation9 + $0x2]] }
  0xa5   : > { %v2110_v45 = vmov 16   ;;  %v2111_v46 = vmov 11   ;;  %v2112_v47 = vmov 5   ;;  %v2113_v48 = vmov 4   ;;  %s2561_s18 = sld [smem:[#allocation9 + $0x3]]  ;;  %s2563_s29 = sld [smem:[#allocation9 + $0x4]] }
  0xa6   : > { %459 = vmatpush1.bf16.msra.mxu0 %v1890_v7  ;;  %500 = vmatpush1.bf16.msra.mxu1 %v1891_v8  ;;  %v2114_v49 = vmov 13   ;;  %v2115_v50 = vmov 12   ;;  %v2116_v51 = vmov 6   ;;  %v2117_v52 = vmov 24   ;;  %s2565_s12 = sld [smem:[#allocation9 + $0x5]]  ;;  %s2568_s17 = sld [smem:[#allocation9 + $0x6]] }
  0xa7   : > { %1695 = vmatprep.subr.bf16.mxu0 %v2959_v11  ;;  %1703 = vmatprep.subr.bf16.mxu1 %v2959_v11  ;;  %v2118_v53 = vmov 26   ;;  %v2119_v54 = vmov 15   ;;  %v2120_v55 = vmov 17   ;;  %v2121_v56 = vmov 28   ;;  %s2570_s2 = sld [smem:[#allocation9 + $0x7]]  ;;  %s2572_s10 = sld [smem:[#allocation9 + $0x8]] }
  0xa8   : > { %v2426_v18 = vld [vmem:[%s2999_s3] sm:$0x1f]  ;;  %v2122_v57 = vmov 22   ;;  %v2123_v58 = vmov 25   ;;  %v2124_v59 = vmov 31   ;;  %v2125_v60 = vmov 18  }
  0xa9   : > { %1638 = vmatmul.mubr.msk.bf16.vlgmr.msra.gmra.mrb[0].mxu0 %vm452_vm0, %v360_v9  ;;  %1639 = vmatmul.mubr.msk.bf16.vlgmr.msra.gmra.mrb[0].mxu1 %vm452_vm0, %v360_v9  ;;  %v378_v19 = vrot.slane %v2426_v18, %v2415_v15  ;;  %v382_v20 = vrot.slane %v2426_v18, %v2418_v16  ;;  %v390_v21 = vrot.slane %v2426_v18, %v2421_v17  ;;  %v2126_v61 = vmov 14   ;;  %s2574_s13 = sld [smem:[#allocation9 + $0x9]]  ;;  %s2578_s0 = sld [smem:[#allocation9 + $0xa]] }
  0xaa   : > { %1696 = vmatpush3.bf16.msra.mxu0 %v1892_v10  ;;  %1699 = vmatprep.mubr.msk.bf16.mxu0 %vm2103_vm1, %v2959_v11  ;;  %v2127_v62 = vmov 7   ;;  %v2128_v63 = vmov 19   ;;  %v2477_v0 = vsub.s32 4, %v2412_v14  ;;  %v2129_v2 = vmov 27   ;;  %s2580_s9 = sld [smem:[#allocation9 + $0xb]]  ;;  %s2584_s16 = sld [smem:[#allocation9 + $0xc]] }
  0xab   : > { %1697 = vmatprep.subr.bf16.mxu0 %v2959_v11  ;;  %1705 = vmatprep.mubr.msk.bf16.mxu1 %vm2103_vm1, %v2959_v11  ;;  %v2130_v4 = vmov 20   ;;  %v2131_v5 = vmov 21   ;;  %v2132_v6 = vmov 29   ;;  %v2133_v7 = vmov 30   ;;  %s2588_s30 = sld [smem:[#allocation9 + $0xe]]  ;;  %s2590_s22 = sld [smem:[#allocation9 + $0xf]] }
  0xac   : > { %v394_v1 = vrot.slane %v2426_v18, %v2477_v0  ;;  %v2134_v8 = vmov 23   ;;  %s2592_s1 = sld [smem:[#allocation9 + $0x10]]  ;;  %s2594_s3 = sld [smem:[#allocation9 + $0x11]]  ;;  %vm770_vm4 = vcmask 64512   ;;  %vm1390_vm5 = vcmask 130048  }
  0xad   : > { %s2597_s20 = sld [smem:[#allocation9 + $0x12]]  ;;  %s2599_s26 = sld [smem:[#allocation9 + $0x13]]  ;;  %vm1392_vm6 = vcmask 195584   ;;  %vm1454_vm7 = vcmask 523264   ;;  %vm1456_vm8 = vcmask 785408  }
  0xae   : > { %1698 = vmatpush3.bf16.msra.mxu0 %v1893_v12  ;;  %s2601_s25 = sld [smem:[#allocation9 + $0x14]]  ;;  %s2603_s11 = sld [smem:[#allocation9 + $0x15]] }
  0xaf   : > { %1709 = vmatprep.subr.bf16.mxu0 %v2959_v11  ;;  %s2607_s27 = sld [smem:[#allocation9 + $0x16]]  ;;  %s2609_s8 = sld [smem:[#allocation9 + $0x17]] }
  0xb0   : > { %s2617_s24 = sld [smem:[#allocation9 + $0x18]]  ;;  %s2619_s7 = sld [smem:[#allocation9 + $0x19]] }
  0xb1   : > { %1700 = vmatmul.mubr.msk.bf16.vlgmr.msra.gmra.mrb[4].mxu0 %vm452_vm0, %v360_v9  ;;  %v2490_v9 = vsub.s32 2, %v2412_v14  ;;  %s2629_s15 = sld [smem:[#allocation9 + $0x1a]]  ;;  %s2631_s28 = sld [smem:[#allocation9 + $0x1b]] }
  0xb2   : > { %1711 = vmatprep.mubr.msk.bf16.mxu0 %vm2103_vm1, %v2959_v11 }
  0xb3   : > { %v386_v12 = vrot.slane %v2426_v18, %v2490_v9 }
 0x17c   : > { %v490_v22 = vpop.f32.mrb[0].mxu0  ;;  %v2434_v23 = vpop.f32.mrb[0].mxu1 }
 0x17d   : > { %v491_v24 = vadd.f32 %v490_v22, %v378_v19  ;;  %v492_v25 = vpop.f32.mrb[1].mxu0  ;;  %v533_v26 = vpop.f32.mrb[1].mxu1  ;;  %v532_v19 = vadd.f32 %v2434_v23, %v386_v12 }
 0x17e   : > { %v2436_v27 = vadd.f32 %v492_v25, %v382_v20  ;;  %v2438_v28 = vadd.f32 %v533_v26, %v390_v21  ;;  %v535_v29 = vpop.f32.mrb[2].mxu1  ;;  %v494_v30 = vpop.f32.mrb[2].mxu0 }
 0x17f   : > { %v2440_v31 = vpack.c.bf16 %v491_v24, %v491_v24  ;;  %v536_v32 = vpop.f32.mrb[3].mxu1  ;;  %v495_v33 = vpop.f32.mrb[3].mxu0 }
 0x180   : > { %3000 = vst [vmem:[#allocation26_spill] sm:$0xff] %v2436_v27  ;;  %648 = vperm.xlu1 %1847, %v2438_v28   ;;  %659 = vperm.xlu0 %1845, %v2436_v27  }
 0x181   : > { %3001 = vst [vmem:[#allocation27_spill] sm:$0xff] %v2440_v31  ;;  %v788_v34 = vsel %vm786_vm2, %v2440_v31, 0 }
 0x182   : > { %1704 = vmatpush3.bf16.msra.mxu1 %v788_v34 }
 0x183   : > { %1715 = vmatprep.subr.bf16.mxu1 %v2959_v11 }
 0x184   : > { %1848 = vset.pattern.permute.xlu1 %v2104_v35  ;;  %1846 = vset.pattern.permute.xlu0 %v2105_v36  ;;  %v2447_v37 = vpop.f32.mrb[4].mxu0 }
 0x185   : > { %673 = vperm.xlu1 %1848, %v2436_v27   ;;  %841 = vperm.xlu0 %1846, %v2436_v27   ;;  %v1701_v38 = vpop.f32.mrb[5].mxu0  ;;  %v573_v3 = vadd.f32 %v2447_v37, %v394_v1  ;;  %v3007_v1 = vstv %s2563_s29  ;;  %s2143_s29 = smov 96  }
 0x186   : > { %v575_v39 = vpop.f32.mrb[6].mxu0 }
 0x187   : > { %v1702_v40 = vpop.f32.mrb[7].mxu0 }
 0x189   : > { %831 = vperm.xlu1 %1848, %v2438_v28   ;;  %1849 = vset.pattern.permute.xlu0 %v2106_v41 }
 0x18a   : > { %855 = vperm.xlu0 %1849, %v2436_v27  }
 0x18d   : > { %1850 = vset.pattern.permute.xlu1 %v2107_v42 }
 0x18e   : > { %687 = vperm.xlu1 %1850, %v2436_v27   ;;  %1852 = vset.pattern.permute.xlu0 %v2108_v43 }
 0x18f   : > { %701 = vperm.xlu0 %1852, %v2436_v27  }
 0x192   : > { %1851 = vset.pattern.permute.xlu1 %v2109_v44 }
 0x193   : > { %869 = vperm.xlu1 %1851, %v2436_v27   ;;  %1855 = vset.pattern.permute.xlu0 %v2110_v45 }
 0x194   : > { %1024 = vperm.xlu0 %1855, %v2436_v27  }
 0x197   : > { %1853 = vset.pattern.permute.xlu1 %v2111_v46 }
 0x198   : > { %883 = vperm.xlu1 %1853, %v2436_v27   ;;  %1858 = vset.pattern.permute.xlu0 %v2112_v47 }
 0x199   : > { %729 = vperm.xlu0 %1858, %v2436_v27  }
 0x19c   : > { %1854 = vset.pattern.permute.xlu1 %v2113_v48 }
 0x19d   : > { %715 = vperm.xlu1 %1854, %v2436_v27   ;;  %1861 = vset.pattern.permute.xlu0 %v2114_v49 }
 0x19e   : > { %911 = vperm.xlu0 %1861, %v2436_v27  }
 0x1a1   : > { %1856 = vset.pattern.permute.xlu1 %v2115_v50 }
 0x1a2   : > { %897 = vperm.xlu1 %1856, %v2436_v27   ;;  %1864 = vset.pattern.permute.xlu0 %v2116_v51  ;;  %v643_v51 = vld [vmem:[%s2383_s14] sm:$0xff]  ;;  %s2586_s14 = sld [smem:[#allocation9 + $0xd]] }
 0x1a3   : > { %743 = vperm.xlu0 %1864, %v2436_v27   ;;  %vm644_vm3 = vcmp.lt.f32.partialorder %v643_v51, 1e-05 }
 0x1a6   : > { %1857 = vset.pattern.permute.xlu1 %v2117_v52 }
 0x1a7   : > { %1206 = vperm.xlu1 %1857, %v2436_v27   ;;  %1867 = vset.pattern.permute.xlu0 %v2118_v53 }
 0x1a8   : > { %1234 = vperm.xlu0 %1867, %v2436_v27  }
 0x1ab   : > { %1859 = vset.pattern.permute.xlu1 %v2107_v42 }
 0x1ac   : > { %1014 = vperm.xlu1 %1859, %v2438_v28   ;;  %1870 = vset.pattern.permute.xlu0 %v2119_v54  ;;  %v645_v54 = vsel %vm644_vm3, -1e+09, %v2959_v11 }
 0x1ad   : > { %939 = vperm.xlu0 %1870, %v2436_v27  }
 0x1b0   : > { %1860 = vset.pattern.permute.xlu1 %v2120_v55 }
 0x1b1   : > { %1038 = vperm.xlu1 %1860, %v2436_v27   ;;  %1873 = vset.pattern.permute.xlu0 %v2121_v56 }
 0x1b2   : > { %1262 = vperm.xlu0 %1873, %v2436_v27  }
 0x1b5   : > { %1862 = vset.pattern.permute.xlu1 %v2108_v43 }
 0x1b6   : > { %1196 = vperm.xlu1 %1862, %v2438_v28   ;;  %1876 = vset.pattern.permute.xlu0 %v2122_v57 }
 0x1b7   : > { %1108 = vperm.xlu0 %1876, %v2436_v27  }
 0x1ba   : > { %1863 = vset.pattern.permute.xlu1 %v2123_v58 }
 0x1bb   : > { %1220 = vperm.xlu1 %1863, %v2436_v27   ;;  %1879 = vset.pattern.permute.xlu0 %v2124_v59  ;;  %v2615_v59 = vsub.s32 5, %v2412_v14 }
 0x1bc   : > { %1304 = vperm.xlu0 %1879, %v2436_v27  }
 0x1bf   : > { %1865 = vset.pattern.permute.xlu1 %v2125_v60 }
 0x1c0   : > { %1052 = vperm.xlu1 %1865, %v2436_v27  }
 0x1c4   : > { %1866 = vset.pattern.permute.xlu1 %v2126_v61 }
 0x1c5   : > { %925 = vperm.xlu1 %1866, %v2436_v27  }
 0x1c9   : > { %1868 = vset.pattern.permute.xlu1 %v2127_v62  ;;  %v2624_v62 = vsub.s32 6, %v2412_v14 }
 0x1ca   : > { %757 = vperm.xlu1 %1868, %v2436_v27  }
 0x1ce   : > { %1869 = vset.pattern.permute.xlu1 %v2128_v63  ;;  %v2627_v63 = vsub.s32 7, %v2412_v14 }
 0x1cf   : > { %1066 = vperm.xlu1 %1869, %v2436_v27  }
 0x1d3   : > { %1871 = vset.pattern.permute.xlu1 %v2129_v2 }
 0x1d4   : > { %1248 = vperm.xlu1 %1871, %v2436_v27  }
 0x1d8   : > { %1872 = vset.pattern.permute.xlu1 %v2130_v4 }
 0x1d9   : > { %1080 = vperm.xlu1 %1872, %v2436_v27  }
 0x1da   : > { %610 = vxpose.xlu0.b32.start.end [1/1] (short) (narrow) %v573_v3, 8 }
 0x1dd   : > { %1874 = vset.pattern.permute.xlu1 %v2131_v5 }
 0x1de   : > { %1094 = vperm.xlu1 %1874, %v2436_v27  }
 0x1e2   : > { %1875 = vset.pattern.permute.xlu1 %v2132_v6 }
 0x1e3   : > { %1276 = vperm.xlu1 %1875, %v2436_v27  }
 0x1e7   : > { %1877 = vset.pattern.permute.xlu1 %v2133_v7 }
 0x1e8   : > { %1290 = vperm.xlu1 %1877, %v2436_v27  }
 0x1ec   : > { %1878 = vset.pattern.permute.xlu1 %v2134_v8 }
 0x1ed   : > { %1122 = vperm.xlu1 %1878, %v2436_v27  }
 0x1ff   : > { %v2492_v10 = vpop.permute.xlu1 %648  ;;  %v2511_v30 = vpop.permute.xlu0 %659 }
 0x200   : > { %v651_v56 = vadd.f32 %v2492_v10, %v645_v54 }
 0x204   : > { %v2497_v20 = vpop.permute.xlu1 %673  ;;  %v2515_v23 = vpop.permute.xlu0 %841 }
 0x208   : > { %v832_v21 = vpop.permute.xlu1 %831 }
 0x209   : > { %v2519_v33 = vpop.permute.xlu0 %855  ;;  %v834_v57 = vadd.f32 %v832_v21, %v645_v54 }
 0x20d   : > { %v2499_v22 = vpop.permute.xlu1 %687 }
 0x20e   : > { %v2523_v35 = vpop.permute.xlu0 %701 }
 0x212   : > { %v2501_v24 = vpop.permute.xlu1 %869 }
 0x213   : > { %v2527_v37 = vpop.permute.xlu0 %1024 }
 0x216   : > { %578 = vxpose.xlu1.b32.start.end [1/1] (short) (narrow) %v532_v19, 32 }
 0x217   : > { %v2503_v25 = vpop.permute.xlu1 %883 }
 0x218   : > { %v2531_v39 = vpop.permute.xlu0 %729 }
 0x21c   : > { %v2505_v26 = vpop.permute.xlu1 %715 }
 0x21d   : > { %v2535_v41 = vpop.permute.xlu0 %911 }
 0x221   : > { %v2507_v28 = vpop.permute.xlu1 %897 }
 0x222   : > { %v2539_v43 = vpop.permute.xlu0 %743 }
 0x226   : > { %v2509_v29 = vpop.permute.xlu1 %1206 }
 0x227   : > { %v2543_v45 = vpop.permute.xlu0 %1234 }
 0x22b   : > { %v2513_v18 = vpop.permute.xlu1 %1014 }
 0x22c   : > { %v2547_v47 = vpop.permute.xlu0 %939  ;;  %v1017_v13 = vadd.f32 %v2513_v18, %v645_v54 }
 0x230   : > { %v2517_v32 = vpop.permute.xlu1 %1038 }
 0x231   : > { %v2551_v49 = vpop.permute.xlu0 %1262 }
 0x235   : > { %v2521_v34 = vpop.permute.xlu1 %1196 }
 0x236   : > { %v2576_v52 = vpop.permute.xlu0 %1108  ;;  %v1199_v4 = vadd.f32 %v2521_v34, %v645_v54 }
 0x23a   : > { %v2525_v36 = vpop.permute.xlu1 %1220 }
 0x23b   : > { %v2605_v55 = vpop.permute.xlu0 %1304 }
 0x23c   : > { %3002 = vst [vmem:[#allocation28_spill] sm:$0xff] %v2605_v55 }
 0x23f   : > { %v2529_v38 = vpop.permute.xlu1 %1052 }
 0x244   : > { %v2533_v40 = vpop.permute.xlu1 %925 }
 0x249   : > { %v2537_v42 = vpop.permute.xlu1 %757 }
 0x24e   : > { %v2541_v44 = vpop.permute.xlu1 %1066 }
 0x253   : > { %v2545_v46 = vpop.permute.xlu1 %1248 }
 0x258   : > { %v2549_v48 = vpop.permute.xlu1 %1080 }
 0x25a   : > { %v626_v5 = vpop.trf.xlu0 }
 0x25b   : > { %v655_v8 = vrot.slane %v626_v5, %v2415_v15  ;;  %v838_v12 = vrot.slane %v626_v5, %v2418_v16  ;;  %v1021_v19 = vrot.slane %v626_v5, %v2490_v9  ;;  %v1203_v21 = vrot.slane %v626_v5, %v2421_v17 }
 0x25d   : > { %v2553_v50 = vpop.permute.xlu1 %1094  ;;  %v656_v27 = vadd.f32 %v655_v8, %v651_v56  ;;  %v2667_v31 = vadd.f32 %v838_v12, %v834_v57  ;;  %v2669_v55 = vadd.f32 %v1021_v19, %v1017_v13  ;;  %v2671_v5 = vadd.f32 %v1203_v21, %v1199_v4 }
 0x262   : > { %v2582_v53 = vpop.permute.xlu1 %1276 }
 0x267   : > { %v2612_v58 = vpop.permute.xlu1 %1290 }
 0x26c   : > { %v2653_v51 = vpop.permute.xlu1 %1122 }
 0x296   : > { %v594_v10 = vpop.trf.xlu1 }
 0x297   : > { %v665_v6 = vrot.slane %v594_v10, %v2415_v15  ;;  %v679_v11 = vrot.slane %v594_v10, %v2418_v16  ;;  %v693_v34 = vrot.slane %v594_v10, %v2490_v9  ;;  %v707_v54 = vrot.slane %v594_v10, %v2421_v17 }
 0x298   : > { %v721_v61 = vrot.slane %v594_v10, %v2477_v0  ;;  %v735_v14 = vrot.slane %v594_v10, %v2615_v59  ;;  %v749_v56 = vrot.slane %v594_v10, %v2624_v62  ;;  %v763_v13 = vrot.slane %v594_v10, %v2627_v63 }
 0x299   : > { %v666_v57 = vadd.f32 %v665_v6, %v2511_v30  ;;  %v680_v4 = vadd.f32 %v679_v11, %v2497_v20  ;;  %v694_v8 = vadd.f32 %v693_v34, %v2499_v22  ;;  %v708_v12 = vadd.f32 %v707_v54, %v2523_v35 }
 0x29a   : > { %v2685_v19 = vpop.trf.xlu1  ;;  %v722_v21 = vadd.f32 %v721_v61, %v2505_v26  ;;  %v736_v60 = vadd.f32 %v735_v14, %v2531_v39  ;;  %v750_v2 = vadd.f32 %v749_v56, %v2539_v43  ;;  %v764_v30 = vadd.f32 %v763_v13, %v2537_v42 }
 0x29b   : > { %v847_v11 = vrot.slane %v2685_v19, %v2415_v15  ;;  %v861_v20 = vrot.slane %v2685_v19, %v2418_v16  ;;  %v668_v22 = vand.u32 2147483647, %v666_v57  ;;  %v682_v35 = vand.u32 2147483647, %v680_v4 }
 0x29c   : > { %v696_v6 = vand.u32 2147483647, %v694_v8  ;;  %v710_v26 = vand.u32 2147483647, %v708_v12  ;;  %v724_v14 = vand.u32 2147483647, %v722_v21  ;;  %v875_v39 = vrot.slane %v2685_v19, %v2490_v9 }
 0x29d   : > { %v3003_v43 = vstv %s2555_s19  ;;  %v3004_v61 = vstv %s2557_s21  ;;  %v738_v34 = vand.u32 2147483647, %v736_v60  ;;  %v752_v54 = vand.u32 2147483647, %v750_v2 }
 0x29e   : > { %v670_v42 = vmul.f32 %v3003_v43, %v668_v22  ;;  %v684_v10 = vmul.f32 %v3004_v61, %v682_v35  ;;  %v2701_v56 = vpop.trf.xlu1  ;;  %v3005_v13 = vstv %s2559_s23  ;;  %v3006_v4 = vstv %s2561_s18  ;;  %s2141_s23 = smov 64   ;;  %s2142_s18 = smov 32  }
 0x29f   : > { %v698_v57 = vmul.f32 %v3005_v13, %v696_v6  ;;  %v712_v8 = vmul.f32 %v3006_v4, %v710_v26  ;;  %v726_v12 = vmul.f32 %v3007_v1, %v724_v14  ;;  %v766_v7 = vand.u32 2147483647, %v764_v30 }
 0x2a0   : > { %v1030_v21 = vrot.slane %v2701_v56, %v2415_v15  ;;  %v1044_v3 = vrot.slane %v2701_v56, %v2418_v16  ;;  %v671_v22 = vadd.f32 %v670_v42, %v656_v27  ;;  %v3008_v43 = vstv %s2565_s12  ;;  %s3035_s12 = sld [smem:[#allocation20_spill]] }
 0x2a1   : > { %v740_v35 = vmul.f32 %v3008_v43, %v738_v34  ;;  %v3009_v60 = vstv %s2568_s17  ;;  %v3010_v61 = vstv %s2570_s2  ;;  %v848_v6 = vadd.f32 %v847_v11, %v2515_v23  ;;  %s1627_s17 = sshll.u32 %s2371_s4, 1  ;;  %s3037_s2 = sld [smem:[#allocation23_spill]] }
 0x2a2   : > { %v754_v2 = vmul.f32 %v3009_v60, %v752_v54  ;;  %v768_v18 = vmul.f32 %v3010_v61, %v766_v7  ;;  %v862_v26 = vadd.f32 %v861_v20, %v2519_v33  ;;  %v685_v1 = vadd.f32 %v684_v10, %v671_v22  ;;  %v2726_v42 = vpop.trf.xlu1 }
 0x2a3   : > { %v876_v30 = vadd.f32 %v875_v39, %v2501_v24  ;;  %v889_v14 = vrot.slane %v2685_v19, %v2421_v17  ;;  %v903_v27 = vrot.slane %v2685_v19, %v2477_v0  ;;  %v850_v34 = vand.u32 2147483647, %v848_v6 }
 0x2a4   : > { %v864_v7 = vand.u32 2147483647, %v862_v26  ;;  %v917_v23 = vrot.slane %v2685_v19, %v2615_v59  ;;  %v931_v33 = vrot.slane %v2685_v19, %v2624_v62  ;;  %v1212_v24 = vrot.slane %v2726_v42, %v2415_v15 }
 0x2a5   : > { %v1226_v11 = vrot.slane %v2726_v42, %v2418_v16  ;;  %v699_v20 = vadd.f32 %v698_v57, %v685_v1  ;;  %v878_v39 = vand.u32 2147483647, %v876_v30  ;;  %v3011_v10 = vstv %s2572_s10 }
 0x2a6   : > { %v852_v54 = vmul.f32 %v3011_v10, %v850_v34  ;;  %v3012_v13 = vstv %s2574_s13  ;;  %v890_v22 = vadd.f32 %v889_v14, %v2503_v25  ;;  %v904_v43 = vadd.f32 %v903_v27, %v2507_v28  ;;  %s1683_s10 = sshll.u32 %s3035_s12, 5  ;;  %s358_s13 = scalar_lea.vmem [#allocation10], %s1627_s17 }
 0x2a7   : > { %v866_v4 = vmul.f32 %v3012_v13, %v864_v7  ;;  %v713_v60 = vadd.f32 %v712_v8, %v699_v20  ;;  %v3013_v61 = vstv %s2578_s0  ;;  %v918_v26 = vadd.f32 %v917_v23, %v2535_v41  ;;  %s1499_s0 = sshll.u32 %s358_s13, 4  ;;  %p3040_p6 = scmp.ne.s32.totalorder %s3037_s2, 0  ;;  %s2893_s0 = int_to_ptr.vmem [resolvable:$true] %s1499_s0 }
 0x2a8   : > { %v880_v6 = vmul.f32 %v3013_v61, %v878_v39  ;;  %v932_v57 = vadd.f32 %v931_v33, %v2533_v40  ;;  %v853_v1 = vadd.f32 %v852_v54, %v2667_v31  ;;  %v892_v30 = vand.u32 2147483647, %v890_v22 }
 0x2a9   : > { %v906_v34 = vand.u32 2147483647, %v904_v43  ;;  %v945_v7 = vrot.slane %v2685_v19, %v2627_v63  ;;  %v727_v25 = vadd.f32 %v726_v12, %v713_v60  ;;  %v920_v14 = vand.u32 2147483647, %v918_v26 }
 0x2aa   : > { %v934_v28 = vand.u32 2147483647, %v932_v57  ;;  %v1031_v8 = vadd.f32 %v1030_v21, %v2527_v37  ;;  %v867_v27 = vadd.f32 %v866_v4, %v853_v1  ;;  %v3014_v20 = vstv %s2580_s9 }
 0x2ab   : > { %v894_v39 = vmul.f32 %v3014_v20, %v892_v30  ;;  %v3015_v41 = vstv %s2584_s16  ;;  %v946_v40 = vadd.f32 %v945_v7, %v2547_v47  ;;  %v741_v31 = vadd.f32 %v740_v35, %v727_v25 }
 0x2ac   : > { %v908_v23 = vmul.f32 %v3015_v41, %v906_v34  ;;  %v3016_v33 = vstv %s2586_s14  ;;  %v3017_v54 = vstv %s2588_s30  ;;  %v1033_v19 = vand.u32 2147483647, %v1031_v8  ;;  %s3039_s14 = sld [smem:[#allocation34_spill]] }
 0x2ad   : > { %v922_v10 = vmul.f32 %v3016_v33, %v920_v14  ;;  %v936_v13 = vmul.f32 %v3017_v54, %v934_v28  ;;  %v881_v12 = vadd.f32 %v880_v6, %v867_v27  ;;  %v948_v22 = vand.u32 2147483647, %v946_v40 }
 0x2ae   : > { %v1045_v43 = vadd.f32 %v1044_v3, %v2517_v32  ;;  %v1058_v37 = vrot.slane %v2701_v56, %v2490_v9  ;;  %v755_v21 = vadd.f32 %v754_v2, %v741_v31  ;;  %v3018_v4 = vstv %s2592_s1  ;;  %s2805_s1 = sld [smem:[#allocation9 + $0x1c]] }
 0x2af   : > { %v1035_v60 = vmul.f32 %v3018_v4, %v1033_v19  ;;  %v1072_v47 = vrot.slane %v2701_v56, %v2421_v17  ;;  %v1086_v35 = vrot.slane %v2701_v56, %v2477_v0  ;;  %v895_v61 = vadd.f32 %v894_v39, %v881_v12 }
 0x2b0   : > { %v3019_v26 = vstv %s2590_s22  ;;  %v1047_v6 = vand.u32 2147483647, %v1045_v43  ;;  %v1059_v1 = vadd.f32 %v1058_v37, %v2529_v38  ;;  %v2771_v32 = vadd.f32 %v768_v18, %v755_v21  ;;  %s1485_s22 = scalar_lea.sflag [#allocation4], %s2371_s4 }
 0x2b1   : > { %v950_v57 = vmul.f32 %v3019_v26, %v948_v22  ;;  %v1036_v3 = vadd.f32 %v1035_v60, %v2669_v55  ;;  %v1073_v2 = vadd.f32 %v1072_v47, %v2541_v44  ;;  %v1087_v30 = vadd.f32 %v1086_v35, %v2549_v48 }
 0x2b2   : > { %v909_v34 = vadd.f32 %v908_v23, %v895_v61  ;;  %v3020_v7 = vstv %s2594_s3  ;;  %v1061_v14 = vand.u32 2147483647, %v1059_v1  ;;  %v1100_v28 = vrot.slane %v2701_v56, %v2615_v59  ;;  %s2814_s3 = sld [smem:[#allocation9 + $0x1d]]  ;;  %s2891_s30 = scalar_lea.hbm %s3039_s14, %s1683_s10 }
 0x2b3   : > { %v1049_v25 = vmul.f32 %v3020_v7, %v1047_v6  ;;  %v771_v38 = vsel %vm770_vm4, %v2771_v32, -inf  ;;  %v1075_v18 = vand.u32 2147483647, %v1073_v2  ;;  %v1089_v8 = vand.u32 2147483647, %v1087_v30 }
 0x2b4   : > { %v1114_v55 = vrot.slane %v2701_v56, %v2624_v62  ;;  %772 = vmax.xlane.f32.xlu0 %v771_v38  ;;  %v923_v44 = vadd.f32 %v922_v10, %v909_v34  ;;  %v3021_v20 = vstv %s2597_s20  ;;  %v1101_v39 = vadd.f32 %v1100_v28, %v2553_v50 }
 0x2b5   : > { %v1050_v27 = vadd.f32 %v1049_v25, %v1036_v3  ;;  %v1063_v48 = vmul.f32 %v3021_v20, %v1061_v14  ;;  %v3022_v41 = vstv %s2599_s26  ;;  %v3023_v40 = vstv %s2601_s25  ;;  %s2828_s25 = sld [smem:[#allocation9 + $0x1e]]  ;;  %s2136_s26 = smov 120  }
 0x2b6   : > { %v1077_v23 = vmul.f32 %v3022_v41, %v1075_v18  ;;  %v1091_v31 = vmul.f32 %v3023_v40, %v1089_v8  ;;  %v1115_v33 = vadd.f32 %v1114_v55, %v2576_v52  ;;  %v1128_v54 = vrot.slane %v2701_v56, %v2627_v63  ;;  %v3030_v55 = vld [vmem:[#allocation28_spill] sm:$0xff] }
 0x2b7   : > { %v937_v19 = vadd.f32 %v936_v13, %v923_v44  ;;  %v1064_v12 = vadd.f32 %v1063_v48, %v1050_v27  ;;  %v1103_v22 = vand.u32 2147483647, %v1101_v39  ;;  %v1213_v10 = vadd.f32 %v1212_v24, %v2509_v29 }
 0x2b8   : > { %v1117_v50 = vand.u32 2147483647, %v1115_v33  ;;  %v1129_v43 = vadd.f32 %v1128_v54, %v2653_v51  ;;  %v1227_v52 = vadd.f32 %v1226_v11, %v2525_v36  ;;  %v1240_v56 = vrot.slane %v2726_v42, %v2490_v9 }
 0x2b9   : > { %v2807_v13 = vadd.f32 %v950_v57, %v937_v19  ;;  %v1078_v15 = vadd.f32 %v1077_v23, %v1064_v12  ;;  %v3024_v29 = vstv %s2603_s11  ;;  %v1215_v37 = vand.u32 2147483647, %v1213_v10  ;;  %s2140_s11 = smov 24  }
 0x2ba   : > { %v1105_v24 = vmul.f32 %v3024_v29, %v1103_v22  ;;  %v3025_v21 = vstv %s2607_s27  ;;  %v1131_v4 = vand.u32 2147483647, %v1129_v43  ;;  %v1229_v60 = vand.u32 2147483647, %v1227_v52  ;;  %s2137_s27 = smov 104  }
 0x2bb   : > { %v1119_v51 = vmul.f32 %v3025_v21, %v1117_v50  ;;  %v1241_v16 = vadd.f32 %v1240_v56, %v2543_v45  ;;  %v952_v9 = vsel %vm770_vm4, %v2807_v13, -inf  ;;  %v1092_v36 = vadd.f32 %v1091_v31, %v1078_v15 }
 0x2bc   : > { %v3026_v11 = vstv %s2617_s24  ;;  %v1254_v35 = vrot.slane %v2726_v42, %v2421_v17  ;;  %953 = vmax.xlane.f32.xlu1 %v952_v9  ;;  %v3027_v61 = vstv %s2609_s8  ;;  %v3028_v57 = vstv %s2619_s7  ;;  %s1674_s7 = sld [smem:[#allocation9 + $0x1f]]  ;;  %s2135_s24 = smov 112  }
 0x2bd   : > { %v1217_v47 = vmul.f32 %v3026_v11, %v1215_v37  ;;  %v1133_v26 = vmul.f32 %v3027_v61, %v1131_v4  ;;  %v1231_v6 = vmul.f32 %v3028_v57, %v1229_v60  ;;  %v1243_v1 = vand.u32 2147483647, %v1241_v16  ;;  %s2139_s8 = smov 16  }
 0x2be   : > { %v1268_v45 = vrot.slane %v2726_v42, %v2477_v0  ;;  %v1106_v3 = vadd.f32 %v1105_v24, %v1092_v36  ;;  %v1255_v30 = vadd.f32 %v1254_v35, %v2545_v46  ;;  %v1282_v17 = vrot.slane %v2726_v42, %v2615_v59 }
 0x2bf   : > { %v1218_v2 = vadd.f32 %v1217_v47, %v2671_v5  ;;  %v3029_v34 = vstv %s2629_s15  ;;  %v1296_v0 = vrot.slane %v2726_v42, %v2624_v62  ;;  %v1310_v14 = vrot.slane %v2726_v42, %v2627_v63 }
 0x2c0   : > { %v1245_v7 = vmul.f32 %v3029_v34, %v1243_v1  ;;  %v1269_v25 = vadd.f32 %v1268_v45, %v2551_v49  ;;  %v1120_v28 = vadd.f32 %v1119_v51, %v1106_v3  ;;  %v1257_v38 = vand.u32 2147483647, %v1255_v30 }
 0x2c1   : > { %v1232_v5 = vadd.f32 %v1231_v6, %v1218_v2  ;;  %v1283_v46 = vadd.f32 %v1282_v17, %v2582_v53  ;;  %v1272_v18 = vstv %s2805_s1  ;;  %v1297_v8 = vadd.f32 %v1296_v0, %v2612_v58  ;;  %s2015_s1 = scalar_lea.vmem %s2893_s0, 32 }
 0x2c2   : > { %v1271_v59 = vand.u32 2147483647, %v1269_v25  ;;  %v1311_v49 = vadd.f32 %v1310_v14, %v3030_v55  ;;  %v1134_v44 = vadd.f32 %v1133_v26, %v1120_v28  ;;  %v3031_v20 = vstv %s2631_s28  ;;  %s2138_s28 = smov 8   ;;  %p2016_p1 = scmp.ne.s32.totalorder %s2893_s0, %s2015_s1 }
 0x2c3   : > { %v1246_v27 = vadd.f32 %v1245_v7, %v1232_v5  ;;  %v1259_v62 = vmul.f32 %v3031_v20, %v1257_v38  ;;  %v1285_v48 = vand.u32 2147483647, %v1283_v46  ;;  %v1286_v39 = vstv %s2814_s3  ;;  %s2145_s3 = smov [#allocation10]  }
 0x2c4   : > { %v1135_v63 = vsel %vm770_vm4, %v1134_v44, -inf  ;;  %v1273_v41 = vmul.f32 %v1272_v18, %v1271_v59  ;;  %v1299_v23 = vand.u32 2147483647, %v1297_v8  ;;  %v1300_v40 = vstv %s2828_s25  ;;  %p2017_p8 = pnand %p2016_p1, %p3040_p6  ;;  %s2019_s25 = sshll.u32 %s2145_s3, 4  ;;  %s2020_s25 = int_to_ptr.vmem [resolvable:$false] %s2019_s25 }
 0x2c5   : > { %v1260_v42 = vadd.f32 %v1259_v62, %v1246_v27  ;;  %1136 = vmax.xlane.f32.xlu0 %v1135_v63  ;;  %v1287_v31 = vmul.f32 %v1286_v39, %v1285_v48  ;;  %v1313_v33 = vand.u32 2147483647, %v1311_v49  ;;  %v1314_v54 = vstv %s1674_s7  ;;  %s2021_s7 = scalar_lea.vmem %s2020_s25, 64  ;;  %p2022_p4 = scmp.lt.s32.totalorder %s2893_s0, %s2020_s25 }
 0x2c6   : > { %v1301_v19 = vmul.f32 %v1300_v40, %v1299_v23  ;;  %v3033_v34 = vmov 0.0   ;;  %p2018_p13 = pneg %p2017_p8  ;;  %p2023_p0 = scmp.lt.s32.totalorder %s2021_s7, %s2015_s1 }
 0x2c7   : > { %v1274_v53 = vadd.f32 %v1273_v41, %v1260_v42  ;;  %v1315_v22 = vmul.f32 %v1314_v54, %v1313_v33 }
 0x2c8   : > { %p2024_p5 = por %p2023_p0, %p2022_p4 }
 0x2c9   : > { %v1288_v58 = vadd.f32 %v1287_v31, %v1274_v53 }
 0x2ca   : > { %p2025_p9 = pnand %p2024_p5, %p2018_p13 }
 0x2cb   : > { %v1302_v12 = vadd.f32 %v1301_v19, %v1288_v58 }
 0x2cd   : > { %v1316_v10 = vadd.f32 %v1315_v22, %v1302_v12 }
 0x2cf   : > { %v1317_v50 = vsel %vm770_vm4, %v1316_v10, -inf }
 0x2d0   : > { %1318 = vmax.xlane.f32.xlu0 %v1317_v50 }
 0x341   : > { %v773_v43 = vpop.xlane.xlu0 %772 }
 0x342   : > { %v774_v52 = vsub.f32 %v2771_v32, %v773_v43 }
 0x344   : > { %v775_v56 = vmul.f32 1.442695, %v774_v52 }
 0x346   : > { %1894 = vpow2.f32 %v775_v56  ;;  %v3034_v56 = vld [vmem:[#allocation26_spill] sm:$0xff] }
 0x349   : > { %v954_v15 = vpop.xlane.xlu1 %953 }
 0x34a   : > { %v955_v29 = vsub.f32 %v2807_v13, %v954_v15  ;;  %v3032_v13 = vld [vmem:[#allocation27_spill] sm:$0xff] }
 0x34c   : > { %v956_v24 = vmul.f32 1.442695, %v955_v29 }
 0x34e   : > { %1896 = vpow2.f32 %v956_v24 }
 0x350   : > { %v1895_v37 = vpop.eup %1894 }
 0x351   : > { %v777_v4 = vsel %vm770_vm4, %v1895_v37, 0.0 }
 0x352   : > { %v1137_v21 = vpop.xlane.xlu0 %1136  ;;  %778 = vadd.xlane.f32.xlu0 %v777_v4 }
 0x353   : > { %v1138_v51 = vsub.f32 %v1134_v44, %v1137_v21 }
 0x355   : > { %v1139_v60 = vmul.f32 1.442695, %v1138_v51 }
 0x357   : > { %1898 = vpow2.f32 %v1139_v60 }
 0x358   : > { %v1897_v16 = vpop.eup %1896 }
 0x359   : > { %v958_v9 = vsel %vm770_vm4, %v1897_v16, 0.0 }
 0x35a   : > { %959 = vadd.xlane.f32.xlu1 %v958_v9 }
 0x35d   : > { %v1319_v11 = vpop.xlane.xlu0 %1318 }
 0x35e   : > { %v1320_v47 = vsub.f32 %v1316_v10, %v1319_v11  ;;  %v1677_v11 = vld [vmem:[%s2941_s6] ss:$0 sm:$0xff] }
 0x360   : > { %v1321_v35 = vmul.f32 1.442695, %v1320_v47 }
 0x361   : > { %v1899_v32 = vpop.eup %1898 }
 0x362   : > { %v1141_v36 = vsel %vm770_vm4, %v1899_v32, 0.0  ;;  %1900 = vpow2.f32 %v1321_v35 }
 0x363   : > { %1142 = vadd.xlane.f32.xlu0 %v1141_v36  ;;  %v1676_v36 = vld [vmem:[%s2940_s5] ss:$0 sm:$0xff] }
 0x36b   : > { %1147 = vrot.lane.b32.xlu1 %v3032_v13, %s2135_s24 }
 0x36c   : > { %v1901_v61 = vpop.eup %1900 }
 0x36d   : > { %v1323_v26 = vsel %vm770_vm4, %v1901_v61, 0.0 }
 0x379   : > { %965 = vrot.lane.b32.xlu0 %v3032_v13, %s2136_s26 }
 0x38f   : > { %1324 = vadd.xlane.f32.xlu1 %v1323_v26 }
 0x3a0   : > { %1329 = vrot.lane.b32.xlu1 %v3032_v13, %s2137_s27 }
 0x3df   : > { %v779_v57 = vpop.xlane.xlu0 %778 }
 0x3e0   : > { %1902 = vrcp.f32 %v779_v57 }
 0x3e7   : > { %v960_v6 = vpop.xlane.xlu1 %959 }
 0x3e8   : > { %1904 = vrcp.f32 %v960_v6 }
 0x3ea   : > { %v1903_v1 = vpop.eup %1902 }
 0x3eb   : > { %v781_v45 = vmul.f32 %v1903_v1, %v1895_v37  ;;  %v1148_v3 = vpop.permute.xlu1 %1147 }
 0x3ec   : > { %v1153_v17 = vsel %vm786_vm2, %v1148_v3, 0 }
 0x3ed   : > { %v782_v2 = vpack.c.bf16 %v781_v45, %v781_v45 }
 0x3ef   : > { %1706 = vmatmul.mubr.msk.bf16.vlgmr.msra.gmra.mrb[4].mxu1 %vm770_vm4, %v782_v2 }
 0x3f0   : > { %v1143_v30 = vpop.xlane.xlu0 %1142  ;;  %1716 = vmatpush3.bf16.msra.mxu1 %v1153_v17  ;;  %1717 = vmatprep.mubr.msk.bf16.mxu1 %vm2103_vm1, %v3033_v34  ;;  %v2144_v17 = vmov 1966171168  }
 0x3f1   : > { %1906 = vrcp.f32 %v1143_v30 }
 0x3f2   : > { %v1905_v7 = vpop.eup %1904 }
 0x3f3   : > { %v962_v25 = vmul.f32 %v1905_v7, %v1897_v16 }
 0x3f4   : > { %v966_v0 = vpop.permute.xlu0 %965 }
 0x3f5   : > { %v971_v14 = vsel %vm786_vm2, %v966_v0, 0  ;;  %v963_v28 = vpack.c.bf16 %v962_v25, %v962_v25 }
 0x3f6   : > { %1710 = vmatpush3.bf16.msra.mxu0 %v971_v14 }
 0x3f7   : > { %1721 = vmatprep.subr.bf16.mxu0 %v3033_v34 }
 0x3f9   : > { %1712 = vmatmul.mubr.msk.bf16.vlgmr.msra.gmra.mrb[8].mxu0 %vm770_vm4, %v963_v28 }
 0x3fa   : > { %1723 = vmatprep.mubr.msk.bf16.mxu0 %vm2103_vm1, %v3033_v34  ;;  %v1465_v34 = vunpack.c.l.s4 %v2144_v17 }
 0x3fb   : > { %v1907_v5 = vpop.eup %1906 }
 0x3fc   : > { %v1145_v38 = vmul.f32 %v1907_v5, %v1899_v32  ;;  %v1466_v0 = vunpack.c.0.s8 %v1465_v34 }
 0x3fe   : > { %v1146_v46 = vpack.c.bf16 %v1145_v38, %v1145_v38 }
 0x400   : > { %1718 = vmatmul.mubr.msk.bf16.vlgmr.msra.gmra.mrb[8].mxu1 %vm770_vm4, %v1146_v46 }
 0x41c   : > { %v1325_v59 = vpop.xlane.xlu1 %1324 }
 0x41d   : > { %1908 = vrcp.f32 %v1325_v59 }
 0x420   : > { %v1330_v18 = vpop.permute.xlu1 %1329 }
 0x421   : > { %v1335_v8 = vsel %vm786_vm2, %v1330_v18, 0 }
 0x422   : > { %1722 = vmatpush3.bf16.msra.mxu0 %v1335_v8  ;;  %v3036_v8 = vld [vmem:[#allocation25_spill] sm:$0xff] }
 0x427   : > { %v1909_v55 = vpop.eup %1908 }
 0x428   : > { %v1327_v49 = vmul.f32 %v1909_v55, %v1901_v61  ;;  %v1469_v55 = vsub.s32 %v1466_v0, %v3036_v8 }
 0x42a   : > { %v1328_v44 = vpack.c.bf16 %v1327_v49, %v1327_v49 }
 0x42c   : > { %1724 = vmatmul.mubr.msk.bf16.vlgmr.msra.gmra.mrb[12].mxu0 %vm770_vm4, %v1328_v44 }
 0x4c2   : > { %v824_v27 = vpop.f32.mrb[4].mxu1 }
 0x4c3   : > { %v1707_v20 = vpop.f32.mrb[5].mxu1 }
 0x4c4   : > { %v827_v62 = vpop.f32.mrb[6].mxu1 }
 0x4c5   : > { %v1708_v48 = vpop.f32.mrb[7].mxu1  ;;  %v3038_v62 = vlaneseq }
 0x4c7   : > { %vm1481_vm9 = vcmp.lt.s32.totalorder %v3038_v62, 256 }
 0x4cc   : > { %v1007_v39 = vpop.f32.mrb[8].mxu0 }
 0x4cd   : > { %1378 = vrot.lane.b32.xlu0 %v1007_v39, %s2138_s28  ;;  %v1713_v63 = vpop.f32.mrb[9].mxu0 }
 0x4ce   : > { %v1010_v42 = vpop.f32.mrb[10].mxu0 }
 0x4cf   : > { %v1714_v41 = vpop.f32.mrb[11].mxu0 }
 0x4d3   : > { %v1189_v23 = vpop.f32.mrb[8].mxu1 }
 0x4d4   : > { %1382 = vrot.lane.b32.xlu1 %v1189_v23, %s2139_s8  ;;  %v1719_v40 = vpop.f32.mrb[9].mxu1 }
 0x4d5   : > { %v1192_v53 = vpop.f32.mrb[10].mxu1 }
 0x4d6   : > { %v1720_v31 = vpop.f32.mrb[11].mxu1 }
 0x4ff   : > { %v1371_v33 = vpop.f32.mrb[12].mxu0 }
 0x500   : > { %1386 = vrot.lane.b32.xlu0 %v1371_v33, %s2140_s11  ;;  %v1725_v54 = vpop.f32.mrb[13].mxu0 }
 0x501   : > { %v1374_v58 = vpop.f32.mrb[14].mxu0 }
 0x502   : > { %v1726_v19 = vpop.f32.mrb[15].mxu0 }
 0x53f   : > { %v1379_v12 = vpop.permute.xlu0 %1378 }
 0x540   : > { %v1389_v10 = vsel %vm770_vm4, %v824_v27, %v1379_v12 }
 0x546   : > { %v1383_v22 = vpop.permute.xlu1 %1382 }
 0x547   : > { %v1391_v50 = vsel %vm1390_vm5, %v1389_v10, %v1383_v22 }
 0x572   : > { %v1387_v43 = vpop.permute.xlu0 %1386 }
 0x573   : > { %v1393_v52 = vsel %vm1392_vm6, %v1391_v50, %v1387_v43 }
 0x574   : > { %v1394_v15 = vadd.f32 %v1393_v52, %v3034_v56 }
 0x576   : > { %v1395_v29 = vsel %vm452_vm0, %v1394_v15, 0.0 }
 0x577   : > { %1396 = vadd.xlane.f32.xlu1 %v1395_v29 }
 0x604   : > { %v1397_v24 = vpop.xlane.xlu1 %1396 }
 0x605   : > { %v1399_v37 = vmul.f32 0.03125, %v1397_v24 }
 0x607   : > { %v1400_v21 = vsub.f32 %v1394_v15, %v1399_v37 }
 0x609   : > { %v1401_v51 = vmul.f32 %v1400_v21, %v1400_v21 }
 0x60b   : > { %v1402_v4 = vsel %vm452_vm0, %v1401_v51, 0.0 }
 0x60c   : > { %1403 = vadd.xlane.f32.xlu0 %v1402_v4 }
 0x699   : > { %v1404_v60 = vpop.xlane.xlu0 %1403 }
 0x69a   : > { %v1405_v16 = vmul.f32 0.03125, %v1404_v60 }
 0x69c   : > { %v1406_v9 = vadd.f32 1e-05, %v1405_v16 }
 0x69e   : > { %1910 = vrsqrt.f32 %v1406_v9 }
 0x6a8   : > { %v1911_v32 = vpop.eup %1910 }
 0x6a9   : > { %v1408_v13 = vmul.f32 %v1911_v32, %v1400_v21 }
 0x6ab   : > { %v1416_v47 = vmul.f32 %v1676_v36, %v1408_v13 }
 0x6ad   : > { %v1424_v35 = vadd.f32 %v1677_v11, %v1416_v47 }
 0x6af   : > { %v1425_v61 = vmax.f32 %v1424_v35, 0.0 }
 0x6b1   : > { %v1431_v26 = vrot.slane %v1425_v61, 2  ;;  %v1427_v57 = vrot.slane %v1425_v61, 1  ;;  %v1435_v6 = vrot.slane %v1425_v61, 3  ;;  %v1441_v1 = vrot.slane %v1425_v61, 5 }
 0x6b2   : > { %v1445_v45 = vrot.slane %v1425_v61, 6  ;;  %v1449_v3 = vrot.slane %v1425_v61, 7  ;;  %v1439_v28 = vrot.slane %v1425_v61, 4 }
 0x6b3   : > { %1432 = vrot.lane.b32.xlu1 %v1431_v26, %s2141_s23  ;;  %1428 = vrot.lane.b32.xlu0 %v1427_v57, %s2142_s18 }
 0x6b7   : > { %1436 = vrot.lane.b32.xlu1 %v1435_v6, %s2143_s29  ;;  %1442 = vrot.lane.b32.xlu0 %v1441_v1, %s2142_s18 }
 0x6bb   : > { %1446 = vrot.lane.b32.xlu1 %v1445_v45, %s2141_s23  ;;  %1450 = vrot.lane.b32.xlu0 %v1449_v3, %s2143_s29 }
 0x725   : > { %v1433_v2 = vpop.permute.xlu1 %1432  ;;  %v1429_v30 = vpop.permute.xlu0 %1428 }
 0x726   : > { %v1453_v14 = vsel %vm452_vm0, %v1425_v61, %v1429_v30 }
 0x727   : > { %v1455_v59 = vsel %vm1454_vm7, %v1453_v14, %v1433_v2 }
 0x729   : > { %v1437_v7 = vpop.permute.xlu1 %1436  ;;  %v1443_v25 = vpop.permute.xlu0 %1442 }
 0x72a   : > { %v1458_v5 = vsel %vm452_vm0, %v1439_v28, %v1443_v25  ;;  %v1457_v49 = vsel %vm1456_vm8, %v1455_v59, %v1437_v7 }
 0x72d   : > { %v1447_v38 = vpop.permute.xlu1 %1446  ;;  %v1451_v46 = vpop.permute.xlu0 %1450 }
 0x72e   : > { %v1459_v18 = vsel %vm1454_vm7, %v1458_v5, %v1447_v38 }
 0x72f   : > { %v1460_v44 = vsel %vm1456_vm8, %v1459_v18, %v1451_v46 }
 0x730   : > { %v1463_v27 = vcombine.low %v1457_v49, %v1460_v44 }
 0x732   : > { %v1470_v20 = vrot.slane %v1463_v27, %v1469_v55 }
 0x734   : > { %v1477_v48 = vrot.slane %v1470_v20, %v1469_v55 }
 0x736   : > { %1483 = vst.msk [vmem:[%s358_s13] sm:$0x3] %vm1481_vm9, %v1477_v48 }
 0x737   : > { %2028 = shalt.err (!%p2025_p9)
}
 0x738   : > { %s2029_s4 = scalar_lea.hbm %s2891_s30, 32  ;;  %s2033_s27 = scalar_lea.hbm %s3039_s14, 64 }
 0x739   : > { %p2030_p3 = scmp.ne.s32.totalorder %s2891_s30, %s2029_s4  ;;  %p2034_p2 = scmp.lt.u32.totalorder %s2891_s30, %s3039_s14 }
 0x73a   : > { %p2035_p12 = scmp.lt.u32.totalorder %s2033_s27, %s2029_s4  ;;  %p2037_p1 = scmp.lt.u32.totalorder %s2029_s4, %s2891_s30 }
 0x73b   : > { %p2031_p7 = pnand %p2030_p3, %p3040_p6 }
 0x73c   : > { %p2036_p10 = por %p2035_p12, %p2034_p2 }
 0x73d   : > { %p2032_p11 = pneg %p2031_p7 }
 0x73e   : > { %p2038_p8 = por %p2037_p1, %p2036_p10 }
 0x740   : > { %p2039_p13 = pnand %p2038_p8, %p2032_p11 }
 0x742   : > { %2042 = shalt.err (!%p2039_p13)
}
 0x743   : > { %1739 = dma.vmem_to_hbm [thread:$0]  (%p3040_p6), %s2893_s0, 32, %s2891_s30, %s1485_s22  }
 0x744 PF: > { %s3041_s11 = sld [smem:[#allocation16_spill]]  ;;  %s3042_s15 = sld [smem:[#allocation21_spill]] }
 0x745   : > { %s3043_s20 = sld [smem:[#allocation19_spill]] }
 0x74a   : > { %s1511_s19 = sand.u32 1, %s3041_s11   ;;  %p3044_p4 = scmp.ne.s32.totalorder %s3042_s15, 0 }
 0x74b   : > { %p3045_p0 = scmp.ge.s32.totalorder %s3043_s20, 2  ;;  %s1512_s21 = scalar_lea.sflag [#allocation4], %s1511_s19 }
 0x74d   : > { %p1756_p5 = pnand %p3045_p0, %p3044_p4 }
 0x74f   : > { %2076 = dma.done.wait (!%p1756_p5), %s1512_s21, 32  }
 0x750   : > { %2078 = vsyncadd (!%p1756_p5), %s1512_s21, 4294967264  ;;  %s3046_s27 = sld [smem:[#allocation22_spill]]  ;;  %s3047_s24 = sld [smem:[#allocation17_spill]] }
 0x751   : > { %s3048_s25 = sld [smem:[#allocation18_spill]]  ;;  %s3049_s26 = sld [smem:[#allocation24_spill]] }
 0x756   : > { %p24_p9 = scmp.ge.s32.totalorder %s3046_s27, 4  }
 0x758   :  { %26 = sbr.rel (!%p24_p9) target bundleno = 15 (0xf), region = 115 }
 0x75f   :  { %1517 = vsyncpa [#allocation3], 1 }
 0x760   :  { %1519 = vsyncpa [#allocation3 + $0x1], 1 }
 0x761   :  { %1520 = vsyncpa [#allocation7], 1 }
 0x762   :  { %1522 = vsyncpa [#allocation7 + $0x1], 1 }
 0x763   :  { %1523 = vsyncpa [#allocation4], 1 }
 0x764   :  { %1525 = vsyncpa [#allocation4 + $0x1], 1 }
 0x765   :  { %1526 = vsyncpa [#allocation5], 1 }
 0x766   :  { %1528 = vsyncpa [#allocation5 + $0x1], 1 }

</bundles_post_ra>
